<compile_context>
chip_gen: v7x
topology: tpu7x:2x2x1
jax: 0.10.0
libtpu: 0.0.40
codegen_flags: <defaults>
</compile_context>

<pallas_src>
import math
import functools

import jax
import jax.numpy as jnp
from jax.experimental import pallas as pl
from jax.experimental.pallas import tpu as pltpu


def _layer_norm(x, w, b, eps):
    # x: (R, E) f32; w, b: (1, E) f32.  PyTorch LayerNorm: biased variance.
    mean = jnp.mean(x, axis=-1, keepdims=True)
    xc = x - mean
    var = jnp.mean(xc * xc, axis=-1, keepdims=True)
    inv = jax.lax.rsqrt(var + eps)
    return xc * inv * w + b


def encoder_layer_kernel(
    x_ref,        # (bN, S, E) f32 activations for a batch block
    wqkv_ref,     # (E, 3E)    bf16, pre-transposed in_proj_weight (Q pre-scaled)
    bqkv_ref,     # (1, 3E)    f32 in_proj_bias (Q part pre-scaled)
    wo_ref,       # (E, E)     bf16, pre-transposed out_proj.weight
    bo_ref,       # (1, E)     f32
    w1_ref,       # (E, F)     bf16, pre-transposed linear1.weight
    b1_ref,       # (1, F)     f32
    w2_ref,       # (F, E)     bf16, pre-transposed linear2.weight
    b2_ref,       # (1, E)     f32
    ln1w_ref,     # (1, E)     f32
    ln1b_ref,     # (1, E)     f32
    ln2w_ref,     # (1, E)     f32
    ln2b_ref,     # (1, E)     f32
    o_ref,        # (bN, S, E)
    attn_scratch, # (bN, S, E) f32 VMEM scratch: per-head context accumulation
    *,
    nhead: int,
    eps: float,
):
    x = x_ref[...]                      # (B, S, E) f32
    B, S, E = x.shape
    head_dim = E // nhead

    # ---- self-attention: fused QKV projection over the flattened slab ----
    x2d = x.reshape(B * S, E)
    qkv = jnp.dot(x2d.astype(jnp.bfloat16), wqkv_ref[...],
                  preferred_element_type=jnp.float32) + bqkv_ref[...]   # (B*S, 3E)
    q = qkv[:, 0 * E:1 * E].reshape(B, S, E)   # already scaled by 1/sqrt(head_dim)
    k = qkv[:, 1 * E:2 * E].reshape(B, S, E)
    v = qkv[:, 2 * E:3 * E].reshape(B, S, E)

    # Per-head attention, batched over the bN sequences in this block.
    # Each head's context is written straight into scratch (no concatenate).
    for h in range(nhead):
        sl = slice(h * head_dim, (h + 1) * head_dim)
        qh = q[:, :, sl].astype(jnp.bfloat16)          # (B, S, hd)
        kh = k[:, :, sl].astype(jnp.bfloat16)
        vh = v[:, :, sl].astype(jnp.bfloat16)
        scores = jnp.einsum('bqd,bkd->bqk', qh, kh,
                            preferred_element_type=jnp.float32)         # (B, S, S)
        scores = scores - jnp.max(scores, axis=-1, keepdims=True)
        p = jnp.exp(scores)
        p = p * pl.reciprocal(jnp.sum(p, axis=-1, keepdims=True), approx=True)
        attn_scratch[:, :, sl] = jnp.einsum('bqk,bkd->bqd',
                                            p.astype(jnp.bfloat16), vh,
                                            preferred_element_type=jnp.float32)

    # out projection (flattened slab)
    attn = (jnp.dot(attn_scratch[...].reshape(B * S, E).astype(jnp.bfloat16),
                    wo_ref[...], preferred_element_type=jnp.float32) + bo_ref[...])

    # ---- residual + norm1 (post-norm) ----
    x1 = _layer_norm(x2d + attn, ln1w_ref[...], ln1b_ref[...], eps)

    # ---- feed-forward: linear1 -> relu -> linear2 ----
    h1 = (jnp.dot(x1.astype(jnp.bfloat16), w1_ref[...],
                  preferred_element_type=jnp.float32) + b1_ref[...])
    h1 = jnp.maximum(h1, 0.0)
    ff = (jnp.dot(h1.astype(jnp.bfloat16), w2_ref[...],
                  preferred_element_type=jnp.float32) + b2_ref[...])

    # ---- residual + norm2 ----
    x2 = _layer_norm(x1 + ff, ln2w_ref[...], ln2b_ref[...], eps)

    o_ref[...] = x2.reshape(B, S, E).astype(o_ref.dtype)


def _const_spec(shape):
    """BlockSpec for grid-invariant (weight/bias) operands: single-buffered."""
    idx = lambda b: (0,) * len(shape)
    try:
        return pl.BlockSpec(shape, idx, pipeline_mode=pl.Buffered(1))
    except (TypeError, AttributeError):
        return pl.BlockSpec(shape, idx)


def _vmem_estimate(bN, S, E, F_dim):
    f32, bf16 = 4, 2
    act = 2 * (bN * S * E * f32) * 2                              # in/out blocks, double-buffered
    wts = (E * 3 * E + E * E + E * F_dim + F_dim * E) * bf16      # Buffered(1) weights
    bias = (3 * E + E + F_dim + E + 4 * E) * f32                  # biases + layernorm params
    scratch = bN * S * E * f32                                    # attention scratch
    interm = bN * (S * S + S * F_dim + 6 * S * E + S * 3 * E) * f32
    return act + wts + bias + scratch + interm


def _vmem_limit_bytes(bN, S, E, F_dim):
    est = _vmem_estimate(bN, S, E, F_dim)
    return int(min(max(2 * est + (8 << 20), 32 << 20), 120 << 20))


def _pick_block_batch(N, S, E, F_dim, budget_bytes=48 << 20):
    """Largest divisor of N whose working set fits comfortably in VMEM."""
    best = 1
    for bn in range(1, N + 1):
        if N % bn == 0 and _vmem_estimate(bn, S, E, F_dim) <= budget_bytes:
            best = bn
    return best


def transformer_encoder_layer_batched(x, params, *, nhead, eps=1e-5):
    """x: (N, S, E) batch-major activations, f32.  Grid iterates over batch blocks."""
    N, S, E = x.shape
    F_dim = params["w1_t"].shape[1]
    bN = _pick_block_batch(N, S, E, F_dim)

    kernel = functools.partial(encoder_layer_kernel, nhead=nhead, eps=eps)

    return pl.pallas_call(
        kernel,
        out_shape=jax.ShapeDtypeStruct((N, S, E), x.dtype),
        grid_spec=pltpu.PrefetchScalarGridSpec(
            num_scalar_prefetch=0,
            grid=(N // bN,),
            in_specs=[
                pl.BlockSpec((bN, S, E), lambda b: (b, 0, 0)),   # activations
                _const_spec((E, 3 * E)),                         # wqkv_t
                _const_spec((1, 3 * E)),                         # bqkv
                _const_spec((E, E)),                             # wo_t
                _const_spec((1, E)),                             # bo
                _const_spec((E, F_dim)),                         # w1_t
                _const_spec((1, F_dim)),                         # b1
                _const_spec((F_dim, E)),                         # w2_t
                _const_spec((1, E)),                             # b2
                _const_spec((1, E)),                             # ln1_w
                _const_spec((1, E)),                             # ln1_b
                _const_spec((1, E)),                             # ln2_w
                _const_spec((1, E)),                             # ln2_b
            ],
            out_specs=pl.BlockSpec((bN, S, E), lambda b: (b, 0, 0)),
            scratch_shapes=[pltpu.VMEM((bN, S, E), jnp.float32)],
        ),
        compiler_params=pltpu.CompilerParams(
            dimension_semantics=("parallel",),
            vmem_limit_bytes=_vmem_limit_bytes(bN, S, E, F_dim),
        ),
    )(
        x,
        params["wqkv_t"], params["bqkv"],
        params["wo_t"], params["bo"],
        params["w1_t"], params["b1"],
        params["w2_t"], params["b2"],
        params["ln1_w"], params["ln1_b"],
        params["ln2_w"], params["ln2_b"],
    )


def transformer_encoder_layer(src, params, *, nhead, eps=1e-5):
    """Adapter for the PyTorch layout: src is (S, N, E) (batch_first=False).

    When stacking many layers, keep activations batch-major and call
    transformer_encoder_layer_batched directly to avoid these two transposes.
    """
    x = jnp.transpose(src, (1, 0, 2))                       # (N, S, E)
    y = transformer_encoder_layer_batched(x, params, nhead=nhead, eps=eps)
    return jnp.transpose(y, (1, 0, 2))                      # back to (S, N, E)


def init_params(key, d_model, nhead, dim_feedforward, *, compute_dtype=jnp.bfloat16):
    """Builds PyTorch-equivalent parameters, then pre-transposes / pre-scales /
    bf16-casts the matmul weights once (one-time transform, not a per-call op)."""
    E, F_dim = d_model, dim_feedforward
    head_dim = E // nhead
    scale = 1.0 / math.sqrt(head_dim)
    ks = jax.random.split(key, 6)

    def xavier(k, shape):
        fan_out, fan_in = shape
        bound = math.sqrt(6.0 / (fan_in + fan_out))
        return jax.random.uniform(k, shape, jnp.float32, -bound, bound)

    in_w = xavier(ks[0], (3 * E, E))                 # PyTorch in_proj_weight layout
    in_b = jnp.zeros((3 * E,), jnp.float32)
    out_w = xavier(ks[1], (E, E))
    out_b = jnp.zeros((E,), jnp.float32)
    w1 = xavier(ks[2], (F_dim, E))
    b1 = 0.01 * jax.random.normal(ks[3], (F_dim,), jnp.float32)
    w2 = xavier(ks[4], (E, F_dim))
    b2 = 0.01 * jax.random.normal(ks[5], (E,), jnp.float32)

    # Fold the 1/sqrt(head_dim) attention scale into the Q projection.
    in_w = in_w.at[:E].multiply(scale)
    in_b = in_b.at[:E].multiply(scale)

    return {
        # pre-transposed bf16 matmul operands
        "wqkv_t": in_w.T.astype(compute_dtype),      # (E, 3E)
        "wo_t":   out_w.T.astype(compute_dtype),     # (E, E)
        "w1_t":   w1.T.astype(compute_dtype),        # (E, F)
        "w2_t":   w2.T.astype(compute_dtype),        # (F, E)
        # f32 biases / layernorm params (element-wise path stays f32)
        "bqkv": in_b.reshape(1, 3 * E),
        "bo":   out_b.reshape(1, E),
        "b1":   b1.reshape(1, F_dim),
        "b2":   b2.reshape(1, E),
        "ln1_w": jnp.ones((1, E), jnp.float32),
        "ln1_b": jnp.zeros((1, E), jnp.float32),
        "ln2_w": jnp.ones((1, E), jnp.float32),
        "ln2_b": jnp.zeros((1, E), jnp.float32),
    }


if __name__ == "__main__":
    # Small shapes consistent with the module, chosen lane/sublane friendly:
    # batch N=2, seq S=16 (multiple of 8), d_model E=128 and
    # dim_feedforward F=256 (multiples of 128 -> lane-dense stores), 4 heads.
    N, S, E, H, F_dim = 2, 16, 128, 4, 256

    key = jax.random.PRNGKey(0)
    k_src, k_par = jax.random.split(key)
    # Batch-major activations (N, S, E); per-sequence math is identical to the
    # PyTorch (S, N, E) layout -- use transformer_encoder_layer() for that API.
    x = jax.random.normal(k_src, (N, S, E), jnp.float32)
    params = init_params(k_par, E, H, F_dim)

    out = transformer_encoder_layer_batched(x, params, nhead=H, eps=1e-5)
    out = jax.block_until_ready(out)
    assert out.shape == (N, S, E)
    assert bool(jnp.all(jnp.isfinite(out)))
    print("KERNEL_OK")
</pallas_src>

<mosaic_0001>
module attributes {stable_mosaic.version = 11 : i64} {
  func.func @encoder_layer_kernel(%arg0: i32, %arg1: memref<2x16x128xf32, #tpu.memory_space<vmem>>, %arg2: memref<128x384xbf16, #tpu.memory_space<vmem>>, %arg3: memref<1x384xf32, #tpu.memory_space<vmem>>, %arg4: memref<128x128xbf16, #tpu.memory_space<vmem>>, %arg5: memref<1x128xf32, #tpu.memory_space<vmem>>, %arg6: memref<128x256xbf16, #tpu.memory_space<vmem>>, %arg7: memref<1x256xf32, #tpu.memory_space<vmem>>, %arg8: memref<256x128xbf16, #tpu.memory_space<vmem>>, %arg9: memref<1x128xf32, #tpu.memory_space<vmem>>, %arg10: memref<1x128xf32, #tpu.memory_space<vmem>>, %arg11: memref<1x128xf32, #tpu.memory_space<vmem>>, %arg12: memref<1x128xf32, #tpu.memory_space<vmem>>, %arg13: memref<1x128xf32, #tpu.memory_space<vmem>>, %arg14: memref<2x16x128xf32, #tpu.memory_space<vmem>>, %arg15: memref<2x16x128xf32, #tpu.memory_space<vmem>>) attributes {dimension_semantics = [#tpu.dimension_semantics<parallel>], iteration_bounds = array<i64: 1>, scalar_prefetch = 0 : i64, scratch_operands = 1 : i64, tpu.core_type = #tpu.core_type<tc>, window_params = [{transform_indices = @transform_0, window_bounds = array<i64: 2, 16, 128>}, {pipeline_mode = #tpu.pipeline_mode<synchronous>, transform_indices = @transform_1, window_bounds = array<i64: 128, 384>}, {pipeline_mode = #tpu.pipeline_mode<synchronous>, transform_indices = @transform_2, window_bounds = array<i64: 1, 384>}, {pipeline_mode = #tpu.pipeline_mode<synchronous>, transform_indices = @transform_3, window_bounds = array<i64: 128, 128>}, {pipeline_mode = #tpu.pipeline_mode<synchronous>, transform_indices = @transform_4, window_bounds = array<i64: 1, 128>}, {pipeline_mode = #tpu.pipeline_mode<synchronous>, transform_indices = @transform_5, window_bounds = array<i64: 128, 256>}, {pipeline_mode = #tpu.pipeline_mode<synchronous>, transform_indices = @transform_6, window_bounds = array<i64: 1, 256>}, {pipeline_mode = #tpu.pipeline_mode<synchronous>, transform_indices = @transform_7, window_bounds = array<i64: 256, 128>}, {pipeline_mode = #tpu.pipeline_mode<synchronous>, transform_indices = @transform_8, window_bounds = array<i64: 1, 128>}, {pipeline_mode = #tpu.pipeline_mode<synchronous>, transform_indices = @transform_9, window_bounds = array<i64: 1, 128>}, {pipeline_mode = #tpu.pipeline_mode<synchronous>, transform_indices = @transform_10, window_bounds = array<i64: 1, 128>}, {pipeline_mode = #tpu.pipeline_mode<synchronous>, transform_indices = @transform_11, window_bounds = array<i64: 1, 128>}, {pipeline_mode = #tpu.pipeline_mode<synchronous>, transform_indices = @transform_12, window_bounds = array<i64: 1, 128>}, {transform_indices = @transform_13, window_bounds = array<i64: 2, 16, 128>}]} {
    %c0 = arith.constant 0 : index
    %c0_0 = arith.constant 0 : index
    %c0_1 = arith.constant 0 : index
    %0 = vector.load %arg1[%c0, %c0_0, %c0_1] : memref<2x16x128xf32, #tpu.memory_space<vmem>>, vector<2x16x128xf32>
    %1 = vector.shape_cast %0 : vector<2x16x128xf32> to vector<32x128xf32>
    %2 = arith.truncf %1 : vector<32x128xf32> to vector<32x128xbf16>
    %c0_2 = arith.constant 0 : index
    %c0_3 = arith.constant 0 : index
    %3 = vector.load %arg2[%c0_2, %c0_3] : memref<128x384xbf16, #tpu.memory_space<vmem>>, vector<128x384xbf16>
    %cst = arith.constant dense<0.000000e+00> : vector<32x384xf32>
    %4 = tpu.matmul %2, %3, %cst {dimension_numbers = #tpu.dot_dimension_numbers<[1], [0], [0], [1], [0, 0, 1, 1], [], []>} : vector<32x128xbf16>, vector<128x384xbf16>, vector<32x384xf32> -> vector<32x384xf32>
    %c0_4 = arith.constant 0 : index
    %c0_5 = arith.constant 0 : index
    %5 = vector.load %arg3[%c0_4, %c0_5] : memref<1x384xf32, #tpu.memory_space<vmem>>, vector<1x384xf32>
    %6 = vector.broadcast %5 : vector<1x384xf32> to vector<32x384xf32>
    %7 = arith.addf %4, %6 : vector<32x384xf32>
    %8 = vector.extract_strided_slice %7 {offsets = [0, 0], sizes = [32, 128], strides = [1, 1]} : vector<32x384xf32> to vector<32x128xf32>
    %9 = vector.shape_cast %8 : vector<32x128xf32> to vector<2x16x128xf32>
    %10 = vector.extract_strided_slice %7 {offsets = [0, 128], sizes = [32, 128], strides = [1, 1]} : vector<32x384xf32> to vector<32x128xf32>
    %11 = vector.shape_cast %10 : vector<32x128xf32> to vector<2x16x128xf32>
    %12 = vector.extract_strided_slice %7 {offsets = [0, 256], sizes = [32, 128], strides = [1, 1]} : vector<32x384xf32> to vector<32x128xf32>
    %13 = vector.shape_cast %12 : vector<32x128xf32> to vector<2x16x128xf32>
    %14 = vector.extract_strided_slice %9 {offsets = [0, 0, 0], sizes = [2, 16, 32], strides = [1, 1, 1]} : vector<2x16x128xf32> to vector<2x16x32xf32>
    %15 = arith.truncf %14 : vector<2x16x32xf32> to vector<2x16x32xbf16>
    %16 = vector.extract_strided_slice %11 {offsets = [0, 0, 0], sizes = [2, 16, 32], strides = [1, 1, 1]} : vector<2x16x128xf32> to vector<2x16x32xf32>
    %17 = arith.truncf %16 : vector<2x16x32xf32> to vector<2x16x32xbf16>
    %18 = vector.extract_strided_slice %13 {offsets = [0, 0, 0], sizes = [2, 16, 32], strides = [1, 1, 1]} : vector<2x16x128xf32> to vector<2x16x32xf32>
    %19 = arith.truncf %18 : vector<2x16x32xf32> to vector<2x16x32xbf16>
    "tpu.trace_start"() <{level = 10 : i32, message = "bqd,bkd->bqk"}> : () -> ()
    %cst_6 = arith.constant dense<0.000000e+00> : vector<2x16x16xf32>
    %20 = tpu.matmul %15, %17, %cst_6 {dimension_numbers = #tpu.dot_dimension_numbers<[2], [2], [1], [1], [0, 0, 0, 1, 1, 1], [0], [0]>} : vector<2x16x32xbf16>, vector<2x16x32xbf16>, vector<2x16x16xf32> -> vector<2x16x16xf32>
    "tpu.trace_stop"() : () -> ()
    %cst_7 = arith.constant dense<0xFF800000> : vector<2x16xf32>
    %21 = vector.multi_reduction <maximumf>, %20, %cst_7 [2] : vector<2x16x16xf32> to vector<2x16xf32>
    %22 = vector.shape_cast %21 : vector<2x16xf32> to vector<2x16x1xf32>
    %23 = vector.broadcast %22 : vector<2x16x1xf32> to vector<2x16x16xf32>
    %24 = arith.subf %20, %23 : vector<2x16x16xf32>
    %25 = math.exp %24 : vector<2x16x16xf32>
    %cst_8 = arith.constant dense<0.000000e+00> : vector<2x16xf32>
    %26 = vector.multi_reduction <add>, %25, %cst_8 [2] : vector<2x16x16xf32> to vector<2x16xf32>
    %27 = vector.shape_cast %26 : vector<2x16xf32> to vector<2x16x1xf32>
    %28 = tpu.reciprocal %27 {approx = true} : vector<2x16x1xf32> -> vector<2x16x1xf32>
    %29 = vector.broadcast %28 : vector<2x16x1xf32> to vector<2x16x16xf32>
    %30 = arith.mulf %25, %29 : vector<2x16x16xf32>
    %31 = arith.truncf %30 : vector<2x16x16xf32> to vector<2x16x16xbf16>
    "tpu.trace_start"() <{level = 10 : i32, message = "bqk,bkd->bqd"}> : () -> ()
    %cst_9 = arith.constant dense<0.000000e+00> : vector<2x16x32xf32>
    %32 = tpu.matmul %31, %19, %cst_9 {dimension_numbers = #tpu.dot_dimension_numbers<[2], [1], [1], [2], [0, 0, 0, 1, 1, 2], [0], [0]>} : vector<2x16x16xbf16>, vector<2x16x32xbf16>, vector<2x16x32xf32> -> vector<2x16x32xf32>
    "tpu.trace_stop"() : () -> ()
    %c0_10 = arith.constant 0 : index
    %c0_11 = arith.constant 0 : index
    %c0_12 = arith.constant 0 : index
    %33 = vector.load %arg15[%c0_10, %c0_11, %c0_12] : memref<2x16x128xf32, #tpu.memory_space<vmem>>, vector<2x16x32xf32>
    tpu.vector_store %arg15[%c0_10, %c0_11, %c0_12], %32 {strides = array<i32>} : memref<2x16x128xf32, #tpu.memory_space<vmem>>, vector<2x16x32xf32>,
    %34 = vector.extract_strided_slice %9 {offsets = [0, 0, 32], sizes = [2, 16, 32], strides = [1, 1, 1]} : vector<2x16x128xf32> to vector<2x16x32xf32>
    %35 = arith.truncf %34 : vector<2x16x32xf32> to vector<2x16x32xbf16>
    %36 = vector.extract_strided_slice %11 {offsets = [0, 0, 32], sizes = [2, 16, 32], strides = [1, 1, 1]} : vector<2x16x128xf32> to vector<2x16x32xf32>
    %37 = arith.truncf %36 : vector<2x16x32xf32> to vector<2x16x32xbf16>
    %38 = vector.extract_strided_slice %13 {offsets = [0, 0, 32], sizes = [2, 16, 32], strides = [1, 1, 1]} : vector<2x16x128xf32> to vector<2x16x32xf32>
    %39 = arith.truncf %38 : vector<2x16x32xf32> to vector<2x16x32xbf16>
    "tpu.trace_start"() <{level = 10 : i32, message = "bqd,bkd->bqk"}> : () -> ()
    %cst_13 = arith.constant dense<0.000000e+00> : vector<2x16x16xf32>
    %40 = tpu.matmul %35, %37, %cst_13 {dimension_numbers = #tpu.dot_dimension_numbers<[2], [2], [1], [1], [0, 0, 0, 1, 1, 1], [0], [0]>} : vector<2x16x32xbf16>, vector<2x16x32xbf16>, vector<2x16x16xf32> -> vector<2x16x16xf32>
    "tpu.trace_stop"() : () -> ()
    %cst_14 = arith.constant dense<0xFF800000> : vector<2x16xf32>
    %41 = vector.multi_reduction <maximumf>, %40, %cst_14 [2] : vector<2x16x16xf32> to vector<2x16xf32>
    %42 = vector.shape_cast %41 : vector<2x16xf32> to vector<2x16x1xf32>
    %43 = vector.broadcast %42 : vector<2x16x1xf32> to vector<2x16x16xf32>
    %44 = arith.subf %40, %43 : vector<2x16x16xf32>
    %45 = math.exp %44 : vector<2x16x16xf32>
    %cst_15 = arith.constant dense<0.000000e+00> : vector<2x16xf32>
    %46 = vector.multi_reduction <add>, %45, %cst_15 [2] : vector<2x16x16xf32> to vector<2x16xf32>
    %47 = vector.shape_cast %46 : vector<2x16xf32> to vector<2x16x1xf32>
    %48 = tpu.reciprocal %47 {approx = true} : vector<2x16x1xf32> -> vector<2x16x1xf32>
    %49 = vector.broadcast %48 : vector<2x16x1xf32> to vector<2x16x16xf32>
    %50 = arith.mulf %45, %49 : vector<2x16x16xf32>
    %51 = arith.truncf %50 : vector<2x16x16xf32> to vector<2x16x16xbf16>
    "tpu.trace_start"() <{level = 10 : i32, message = "bqk,bkd->bqd"}> : () -> ()
    %cst_16 = arith.constant dense<0.000000e+00> : vector<2x16x32xf32>
    %52 = tpu.matmul %51, %39, %cst_16 {dimension_numbers = #tpu.dot_dimension_numbers<[2], [1], [1], [2], [0, 0, 0, 1, 1, 2], [0], [0]>} : vector<2x16x16xbf16>, vector<2x16x32xbf16>, vector<2x16x32xf32> -> vector<2x16x32xf32>
    "tpu.trace_stop"() : () -> ()
    %c0_17 = arith.constant 0 : index
    %c0_18 = arith.constant 0 : index
    %c32 = arith.constant 32 : index
    %53 = vector.load %arg15[%c0_17, %c0_18, %c32] : memref<2x16x128xf32, #tpu.memory_space<vmem>>, vector<2x16x32xf32>
    tpu.vector_store %arg15[%c0_17, %c0_18, %c32], %52 {strides = array<i32>} : memref<2x16x128xf32, #tpu.memory_space<vmem>>, vector<2x16x32xf32>,
    %54 = vector.extract_strided_slice %9 {offsets = [0, 0, 64], sizes = [2, 16, 32], strides = [1, 1, 1]} : vector<2x16x128xf32> to vector<2x16x32xf32>
    %55 = arith.truncf %54 : vector<2x16x32xf32> to vector<2x16x32xbf16>
    %56 = vector.extract_strided_slice %11 {offsets = [0, 0, 64], sizes = [2, 16, 32], strides = [1, 1, 1]} : vector<2x16x128xf32> to vector<2x16x32xf32>
    %57 = arith.truncf %56 : vector<2x16x32xf32> to vector<2x16x32xbf16>
    %58 = vector.extract_strided_slice %13 {offsets = [0, 0, 64], sizes = [2, 16, 32], strides = [1, 1, 1]} : vector<2x16x128xf32> to vector<2x16x32xf32>
    %59 = arith.truncf %58 : vector<2x16x32xf32> to vector<2x16x32xbf16>
    "tpu.trace_start"() <{level = 10 : i32, message = "bqd,bkd->bqk"}> : () -> ()
    %cst_19 = arith.constant dense<0.000000e+00> : vector<2x16x16xf32>
    %60 = tpu.matmul %55, %57, %cst_19 {dimension_numbers = #tpu.dot_dimension_numbers<[2], [2], [1], [1], [0, 0, 0, 1, 1, 1], [0], [0]>} : vector<2x16x32xbf16>, vector<2x16x32xbf16>, vector<2x16x16xf32> -> vector<2x16x16xf32>
    "tpu.trace_stop"() : () -> ()
    %cst_20 = arith.constant dense<0xFF800000> : vector<2x16xf32>
    %61 = vector.multi_reduction <maximumf>, %60, %cst_20 [2] : vector<2x16x16xf32> to vector<2x16xf32>
    %62 = vector.shape_cast %61 : vector<2x16xf32> to vector<2x16x1xf32>
    %63 = vector.broadcast %62 : vector<2x16x1xf32> to vector<2x16x16xf32>
    %64 = arith.subf %60, %63 : vector<2x16x16xf32>
    %65 = math.exp %64 : vector<2x16x16xf32>
    %cst_21 = arith.constant dense<0.000000e+00> : vector<2x16xf32>
    %66 = vector.multi_reduction <add>, %65, %cst_21 [2] : vector<2x16x16xf32> to vector<2x16xf32>
    %67 = vector.shape_cast %66 : vector<2x16xf32> to vector<2x16x1xf32>
    %68 = tpu.reciprocal %67 {approx = true} : vector<2x16x1xf32> -> vector<2x16x1xf32>
    %69 = vector.broadcast %68 : vector<2x16x1xf32> to vector<2x16x16xf32>
    %70 = arith.mulf %65, %69 : vector<2x16x16xf32>
    %71 = arith.truncf %70 : vector<2x16x16xf32> to vector<2x16x16xbf16>
    "tpu.trace_start"() <{level = 10 : i32, message = "bqk,bkd->bqd"}> : () -> ()
    %cst_22 = arith.constant dense<0.000000e+00> : vector<2x16x32xf32>
    %72 = tpu.matmul %71, %59, %cst_22 {dimension_numbers = #tpu.dot_dimension_numbers<[2], [1], [1], [2], [0, 0, 0, 1, 1, 2], [0], [0]>} : vector<2x16x16xbf16>, vector<2x16x32xbf16>, vector<2x16x32xf32> -> vector<2x16x32xf32>
    "tpu.trace_stop"() : () -> ()
    %c0_23 = arith.constant 0 : index
    %c0_24 = arith.constant 0 : index
    %c64 = arith.constant 64 : index
    %73 = vector.load %arg15[%c0_23, %c0_24, %c64] : memref<2x16x128xf32, #tpu.memory_space<vmem>>, vector<2x16x32xf32>
    tpu.vector_store %arg15[%c0_23, %c0_24, %c64], %72 {strides = array<i32>} : memref<2x16x128xf32, #tpu.memory_space<vmem>>, vector<2x16x32xf32>,
    %74 = vector.extract_strided_slice %9 {offsets = [0, 0, 96], sizes = [2, 16, 32], strides = [1, 1, 1]} : vector<2x16x128xf32> to vector<2x16x32xf32>
    %75 = arith.truncf %74 : vector<2x16x32xf32> to vector<2x16x32xbf16>
    %76 = vector.extract_strided_slice %11 {offsets = [0, 0, 96], sizes = [2, 16, 32], strides = [1, 1, 1]} : vector<2x16x128xf32> to vector<2x16x32xf32>
    %77 = arith.truncf %76 : vector<2x16x32xf32> to vector<2x16x32xbf16>
    %78 = vector.extract_strided_slice %13 {offsets = [0, 0, 96], sizes = [2, 16, 32], strides = [1, 1, 1]} : vector<2x16x128xf32> to vector<2x16x32xf32>
    %79 = arith.truncf %78 : vector<2x16x32xf32> to vector<2x16x32xbf16>
    "tpu.trace_start"() <{level = 10 : i32, message = "bqd,bkd->bqk"}> : () -> ()
    %cst_25 = arith.constant dense<0.000000e+00> : vector<2x16x16xf32>
    %80 = tpu.matmul %75, %77, %cst_25 {dimension_numbers = #tpu.dot_dimension_numbers<[2], [2], [1], [1], [0, 0, 0, 1, 1, 1], [0], [0]>} : vector<2x16x32xbf16>, vector<2x16x32xbf16>, vector<2x16x16xf32> -> vector<2x16x16xf32>
    "tpu.trace_stop"() : () -> ()
    %cst_26 = arith.constant dense<0xFF800000> : vector<2x16xf32>
    %81 = vector.multi_reduction <maximumf>, %80, %cst_26 [2] : vector<2x16x16xf32> to vector<2x16xf32>
    %82 = vector.shape_cast %81 : vector<2x16xf32> to vector<2x16x1xf32>
    %83 = vector.broadcast %82 : vector<2x16x1xf32> to vector<2x16x16xf32>
    %84 = arith.subf %80, %83 : vector<2x16x16xf32>
    %85 = math.exp %84 : vector<2x16x16xf32>
    %cst_27 = arith.constant dense<0.000000e+00> : vector<2x16xf32>
    %86 = vector.multi_reduction <add>, %85, %cst_27 [2] : vector<2x16x16xf32> to vector<2x16xf32>
    %87 = vector.shape_cast %86 : vector<2x16xf32> to vector<2x16x1xf32>
    %88 = tpu.reciprocal %87 {approx = true} : vector<2x16x1xf32> -> vector<2x16x1xf32>
    %89 = vector.broadcast %88 : vector<2x16x1xf32> to vector<2x16x16xf32>
    %90 = arith.mulf %85, %89 : vector<2x16x16xf32>
    %91 = arith.truncf %90 : vector<2x16x16xf32> to vector<2x16x16xbf16>
    "tpu.trace_start"() <{level = 10 : i32, message = "bqk,bkd->bqd"}> : () -> ()
    %cst_28 = arith.constant dense<0.000000e+00> : vector<2x16x32xf32>
    %92 = tpu.matmul %91, %79, %cst_28 {dimension_numbers = #tpu.dot_dimension_numbers<[2], [1], [1], [2], [0, 0, 0, 1, 1, 2], [0], [0]>} : vector<2x16x16xbf16>, vector<2x16x32xbf16>, vector<2x16x32xf32> -> vector<2x16x32xf32>
    "tpu.trace_stop"() : () -> ()
    %c0_29 = arith.constant 0 : index
    %c0_30 = arith.constant 0 : index
    %c96 = arith.constant 96 : index
    %93 = vector.load %arg15[%c0_29, %c0_30, %c96] : memref<2x16x128xf32, #tpu.memory_space<vmem>>, vector<2x16x32xf32>
    tpu.vector_store %arg15[%c0_29, %c0_30, %c96], %92 {strides = array<i32>} : memref<2x16x128xf32, #tpu.memory_space<vmem>>, vector<2x16x32xf32>,
    %c0_31 = arith.constant 0 : index
    %c0_32 = arith.constant 0 : index
    %c0_33 = arith.constant 0 : index
    %94 = vector.load %arg15[%c0_31, %c0_32, %c0_33] : memref<2x16x128xf32, #tpu.memory_space<vmem>>, vector<2x16x128xf32>
    %95 = vector.shape_cast %94 : vector<2x16x128xf32> to vector<32x128xf32>
    %96 = arith.truncf %95 : vector<32x128xf32> to vector<32x128xbf16>
    %c0_34 = arith.constant 0 : index
    %c0_35 = arith.constant 0 : index
    %97 = vector.load %arg4[%c0_34, %c0_35] : memref<128x128xbf16, #tpu.memory_space<vmem>>, vector<128x128xbf16>
    %cst_36 = arith.constant dense<0.000000e+00> : vector<32x128xf32>
    %98 = tpu.matmul %96, %97, %cst_36 {dimension_numbers = #tpu.dot_dimension_numbers<[1], [0], [0], [1], [0, 0, 1, 1], [], []>} : vector<32x128xbf16>, vector<128x128xbf16>, vector<32x128xf32> -> vector<32x128xf32>
    %c0_37 = arith.constant 0 : index
    %c0_38 = arith.constant 0 : index
    %99 = vector.load %arg5[%c0_37, %c0_38] : memref<1x128xf32, #tpu.memory_space<vmem>>, vector<1x128xf32>
    %100 = vector.broadcast %99 : vector<1x128xf32> to vector<32x128xf32>
    %101 = arith.addf %98, %100 : vector<32x128xf32>
    %102 = arith.addf %1, %101 : vector<32x128xf32>
    %c0_39 = arith.constant 0 : index
    %c0_40 = arith.constant 0 : index
    %103 = vector.load %arg10[%c0_39, %c0_40] : memref<1x128xf32, #tpu.memory_space<vmem>>, vector<1x128xf32>
    %c0_41 = arith.constant 0 : index
    %c0_42 = arith.constant 0 : index
    %104 = vector.load %arg11[%c0_41, %c0_42] : memref<1x128xf32, #tpu.memory_space<vmem>>, vector<1x128xf32>
    %cst_43 = arith.constant dense<0.000000e+00> : vector<32xf32>
    %105 = vector.multi_reduction <add>, %102, %cst_43 [1] : vector<32x128xf32> to vector<32xf32>
    %106 = vector.shape_cast %105 : vector<32xf32> to vector<32x1xf32>
    %cst_44 = arith.constant 1.280000e+02 : f32
    %107 = vector.broadcast %cst_44 : f32 to vector<32x1xf32>
    %108 = arith.divf %106, %107 : vector<32x1xf32>
    %109 = vector.broadcast %108 : vector<32x1xf32> to vector<32x128xf32>
    %110 = arith.subf %102, %109 : vector<32x128xf32>
    %111 = arith.mulf %110, %110 : vector<32x128xf32>
    %cst_45 = arith.constant dense<0.000000e+00> : vector<32xf32>
    %112 = vector.multi_reduction <add>, %111, %cst_45 [1] : vector<32x128xf32> to vector<32xf32>
    %113 = vector.shape_cast %112 : vector<32xf32> to vector<32x1xf32>
    %cst_46 = arith.constant 1.280000e+02 : f32
    %114 = vector.broadcast %cst_46 : f32 to vector<32x1xf32>
    %115 = arith.divf %113, %114 : vector<32x1xf32>
    %cst_47 = arith.constant 9.99999974E-6 : f32
    %116 = vector.broadcast %cst_47 : f32 to vector<32x1xf32>
    %117 = arith.addf %115, %116 : vector<32x1xf32>
    %118 = math.rsqrt %117 : vector<32x1xf32>
    %119 = vector.broadcast %118 : vector<32x1xf32> to vector<32x128xf32>
    %120 = arith.mulf %110, %119 : vector<32x128xf32>
    %121 = vector.broadcast %103 : vector<1x128xf32> to vector<32x128xf32>
    %122 = arith.mulf %120, %121 : vector<32x128xf32>
    %123 = vector.broadcast %104 : vector<1x128xf32> to vector<32x128xf32>
    %124 = arith.addf %122, %123 : vector<32x128xf32>
    %125 = arith.truncf %124 : vector<32x128xf32> to vector<32x128xbf16>
    %c0_48 = arith.constant 0 : index
    %c0_49 = arith.constant 0 : index
    %126 = vector.load %arg6[%c0_48, %c0_49] : memref<128x256xbf16, #tpu.memory_space<vmem>>, vector<128x256xbf16>
    %cst_50 = arith.constant dense<0.000000e+00> : vector<32x256xf32>
    %127 = tpu.matmul %125, %126, %cst_50 {dimension_numbers = #tpu.dot_dimension_numbers<[1], [0], [0], [1], [0, 0, 1, 1], [], []>} : vector<32x128xbf16>, vector<128x256xbf16>, vector<32x256xf32> -> vector<32x256xf32>
    %c0_51 = arith.constant 0 : index
    %c0_52 = arith.constant 0 : index
    %128 = vector.load %arg7[%c0_51, %c0_52] : memref<1x256xf32, #tpu.memory_space<vmem>>, vector<1x256xf32>
    %129 = vector.broadcast %128 : vector<1x256xf32> to vector<32x256xf32>
    %130 = arith.addf %127, %129 : vector<32x256xf32>
    %cst_53 = arith.constant 0.000000e+00 : f32
    %131 = vector.broadcast %cst_53 : f32 to vector<32x256xf32>
    %132 = arith.maximumf %130, %131 : vector<32x256xf32>
    %133 = arith.truncf %132 : vector<32x256xf32> to vector<32x256xbf16>
    %c0_54 = arith.constant 0 : index
    %c0_55 = arith.constant 0 : index
    %134 = vector.load %arg8[%c0_54, %c0_55] : memref<256x128xbf16, #tpu.memory_space<vmem>>, vector<256x128xbf16>
    %cst_56 = arith.constant dense<0.000000e+00> : vector<32x128xf32>
    %135 = tpu.matmul %133, %134, %cst_56 {dimension_numbers = #tpu.dot_dimension_numbers<[1], [0], [0], [1], [0, 0, 1, 1], [], []>} : vector<32x256xbf16>, vector<256x128xbf16>, vector<32x128xf32> -> vector<32x128xf32>
    %c0_57 = arith.constant 0 : index
    %c0_58 = arith.constant 0 : index
    %136 = vector.load %arg9[%c0_57, %c0_58] : memref<1x128xf32, #tpu.memory_space<vmem>>, vector<1x128xf32>
    %137 = vector.broadcast %136 : vector<1x128xf32> to vector<32x128xf32>
    %138 = arith.addf %135, %137 : vector<32x128xf32>
    %139 = arith.addf %124, %138 : vector<32x128xf32>
    %c0_59 = arith.constant 0 : index
    %c0_60 = arith.constant 0 : index
    %140 = vector.load %arg12[%c0_59, %c0_60] : memref<1x128xf32, #tpu.memory_space<vmem>>, vector<1x128xf32>
    %c0_61 = arith.constant 0 : index
    %c0_62 = arith.constant 0 : index
    %141 = vector.load %arg13[%c0_61, %c0_62] : memref<1x128xf32, #tpu.memory_space<vmem>>, vector<1x128xf32>
    %cst_63 = arith.constant dense<0.000000e+00> : vector<32xf32>
    %142 = vector.multi_reduction <add>, %139, %cst_63 [1] : vector<32x128xf32> to vector<32xf32>
    %143 = vector.shape_cast %142 : vector<32xf32> to vector<32x1xf32>
    %cst_64 = arith.constant 1.280000e+02 : f32
    %144 = vector.broadcast %cst_64 : f32 to vector<32x1xf32>
    %145 = arith.divf %143, %144 : vector<32x1xf32>
    %146 = vector.broadcast %145 : vector<32x1xf32> to vector<32x128xf32>
    %147 = arith.subf %139, %146 : vector<32x128xf32>
    %148 = arith.mulf %147, %147 : vector<32x128xf32>
    %cst_65 = arith.constant dense<0.000000e+00> : vector<32xf32>
    %149 = vector.multi_reduction <add>, %148, %cst_65 [1] : vector<32x128xf32> to vector<32xf32>
    %150 = vector.shape_cast %149 : vector<32xf32> to vector<32x1xf32>
    %cst_66 = arith.constant 1.280000e+02 : f32
    %151 = vector.broadcast %cst_66 : f32 to vector<32x1xf32>
    %152 = arith.divf %150, %151 : vector<32x1xf32>
    %cst_67 = arith.constant 9.99999974E-6 : f32
    %153 = vector.broadcast %cst_67 : f32 to vector<32x1xf32>
    %154 = arith.addf %152, %153 : vector<32x1xf32>
    %155 = math.rsqrt %154 : vector<32x1xf32>
    %156 = vector.broadcast %155 : vector<32x1xf32> to vector<32x128xf32>
    %157 = arith.mulf %147, %156 : vector<32x128xf32>
    %158 = vector.broadcast %140 : vector<1x128xf32> to vector<32x128xf32>
    %159 = arith.mulf %157, %158 : vector<32x128xf32>
    %160 = vector.broadcast %141 : vector<1x128xf32> to vector<32x128xf32>
    %161 = arith.addf %159, %160 : vector<32x128xf32>
    %162 = vector.shape_cast %161 : vector<32x128xf32> to vector<2x16x128xf32>
    %c0_68 = arith.constant 0 : index
    %c0_69 = arith.constant 0 : index
    %c0_70 = arith.constant 0 : index
    %163 = vector.load %arg14[%c0_68, %c0_69, %c0_70] : memref<2x16x128xf32, #tpu.memory_space<vmem>>, vector<2x16x128xf32>
    tpu.vector_store %arg14[%c0_68, %c0_69, %c0_70], %162 {strides = array<i32>} : memref<2x16x128xf32, #tpu.memory_space<vmem>>, vector<2x16x128xf32>,
    return
  }
  func.func @transform_0(%arg0: i32) -> (i32, i32, i32) {
    %c0_i32 = arith.constant 0 : i32
    %c0_i32_0 = arith.constant 0 : i32
    %c0_i32_1 = arith.constant 0 : i32
    return %arg0, %c0_i32, %c0_i32_0 : i32, i32, i32
  }
  func.func @transform_1(%arg0: i32) -> (i32, i32) {
    %c0_i32 = arith.constant 0 : i32
    %c0_i32_0 = arith.constant 0 : i32
    %c0_i32_1 = arith.constant 0 : i32
    return %c0_i32, %c0_i32_0 : i32, i32
  }
  func.func @transform_2(%arg0: i32) -> (i32, i32) {
    %c0_i32 = arith.constant 0 : i32
    %c0_i32_0 = arith.constant 0 : i32
    %c0_i32_1 = arith.constant 0 : i32
    return %c0_i32, %c0_i32_0 : i32, i32
  }
  func.func @transform_3(%arg0: i32) -> (i32, i32) {
    %c0_i32 = arith.constant 0 : i32
    %c0_i32_0 = arith.constant 0 : i32
    %c0_i32_1 = arith.constant 0 : i32
    return %c0_i32, %c0_i32_0 : i32, i32
  }
  func.func @transform_4(%arg0: i32) -> (i32, i32) {
    %c0_i32 = arith.constant 0 : i32
    %c0_i32_0 = arith.constant 0 : i32
    %c0_i32_1 = arith.constant 0 : i32
    return %c0_i32, %c0_i32_0 : i32, i32
  }
  func.func @transform_5(%arg0: i32) -> (i32, i32) {
    %c0_i32 = arith.constant 0 : i32
    %c0_i32_0 = arith.constant 0 : i32
    %c0_i32_1 = arith.constant 0 : i32
    return %c0_i32, %c0_i32_0 : i32, i32
  }
  func.func @transform_6(%arg0: i32) -> (i32, i32) {
    %c0_i32 = arith.constant 0 : i32
    %c0_i32_0 = arith.constant 0 : i32
    %c0_i32_1 = arith.constant 0 : i32
    return %c0_i32, %c0_i32_0 : i32, i32
  }
  func.func @transform_7(%arg0: i32) -> (i32, i32) {
    %c0_i32 = arith.constant 0 : i32
    %c0_i32_0 = arith.constant 0 : i32
    %c0_i32_1 = arith.constant 0 : i32
    return %c0_i32, %c0_i32_0 : i32, i32
  }
  func.func @transform_8(%arg0: i32) -> (i32, i32) {
    %c0_i32 = arith.constant 0 : i32
    %c0_i32_0 = arith.constant 0 : i32
    %c0_i32_1 = arith.constant 0 : i32
    return %c0_i32, %c0_i32_0 : i32, i32
  }
  func.func @transform_9(%arg0: i32) -> (i32, i32) {
    %c0_i32 = arith.constant 0 : i32
    %c0_i32_0 = arith.constant 0 : i32
    %c0_i32_1 = arith.constant 0 : i32
    return %c0_i32, %c0_i32_0 : i32, i32
  }
  func.func @transform_10(%arg0: i32) -> (i32, i32) {
    %c0_i32 = arith.constant 0 : i32
    %c0_i32_0 = arith.constant 0 : i32
    %c0_i32_1 = arith.constant 0 : i32
    return %c0_i32, %c0_i32_0 : i32, i32
  }
  func.func @transform_11(%arg0: i32) -> (i32, i32) {
    %c0_i32 = arith.constant 0 : i32
    %c0_i32_0 = arith.constant 0 : i32
    %c0_i32_1 = arith.constant 0 : i32
    return %c0_i32, %c0_i32_0 : i32, i32
  }
  func.func @transform_12(%arg0: i32) -> (i32, i32) {
    %c0_i32 = arith.constant 0 : i32
    %c0_i32_0 = arith.constant 0 : i32
    %c0_i32_1 = arith.constant 0 : i32
    return %c0_i32, %c0_i32_0 : i32, i32
  }
  func.func @transform_13(%arg0: i32) -> (i32, i32, i32) {
    %c0_i32 = arith.constant 0 : i32
    %c0_i32_0 = arith.constant 0 : i32
    %c0_i32_1 = arith.constant 0 : i32
    return %arg0, %c0_i32, %c0_i32_0 : i32, i32, i32
  }
}

</mosaic_0001>

<bundles_post_ra>
// kernel: tpu_custom_call.1
= control target key start
LH: loop header
LB: loop body
LE: loop exit
PB: predicated region body
PF: predicated region fallthrough
CT: control target
= control target key end

     0   :  { %18 = vsyncpa [#allocation4], 0  ;;  %s3158_s0 = inlined_call_operand.hbm [shape: f32[2,16,128], index: 0, kind: input, shape index: {}]   ;;  %s3159_s1 = inlined_call_operand.hbm [shape: bf16[128,384], index: 1, kind: input, shape index: {}]   ;;  %s3160_s2 = inlined_call_operand.vmem [shape: f32[1,384], index: 2, kind: input, shape index: {}]   ;;  %s3161_s3 = inlined_call_operand.hbm [shape: bf16[128,128], index: 3, kind: input, shape index: {}]   ;;  %s3162_s4 = inlined_call_operand.vmem [shape: f32[1,128], index: 4, kind: input, shape index: {}]   ;;  %s3163_s5 = inlined_call_operand.hbm [shape: bf16[128,256], index: 5, kind: input, shape index: {}]   ;;  %s3164_s6 = inlined_call_operand.vmem [shape: f32[1,256], index: 6, kind: input, shape index: {}]   ;;  %s3165_s7 = inlined_call_operand.hbm [shape: bf16[256,128], index: 7, kind: input, shape index: {}]   ;;  %s3166_s8 = inlined_call_operand.vmem [shape: f32[1,128], index: 8, kind: input, shape index: {}]   ;;  %s3167_s9 = inlined_call_operand.vmem [shape: f32[1,128], index: 9, kind: input, shape index: {}]   ;;  %s3168_s10 = inlined_call_operand.vmem [shape: f32[1,128], index: 10, kind: input, shape index: {}]   ;;  %s3169_s11 = inlined_call_operand.vmem [shape: f32[1,128], index: 11, kind: input, shape index: {}]   ;;  %s3170_s12 = inlined_call_operand.vmem [shape: f32[1,128], index: 12, kind: input, shape index: {}]   ;;  %s3171_s13 = inlined_call_operand.hbm [shape: f32[2,16,128], index: 13, kind: output, shape index: {}]  }
   0x1   :  { %19 = vsyncpa [#allocation7], 0 }
   0x2   :  { %20 = vsyncpa [#allocation10], 0 }
   0x3   :  { %21 = vsyncpa [#allocation5], 0  ;;  %s2706_s25 = smov [#allocation6]   ;;  %s2566_s29 = scalar_lea.hbm %s3159_s1, 3072 }
   0x4   :  { %s39_s26 = sshll.u32 %s2706_s25, 4  ;;  %p2567_p0 = scmp.ne.s32.totalorder %s3159_s1, %s2566_s29  ;;  %s40_s26 = int_to_ptr.vmem [resolvable:$true] %s39_s26 }
   0x5   :  { %p2570_p1 = scmp.lt.u32.totalorder %s2566_s29, %s3159_s1 }
   0x7   :  { %p2572_p2 = pnand %p2570_p1, %p2567_p0 }
   0x9   :  { %2575 = shalt.err (!%p2572_p2)
}
   0xa   :  { %s2576_s17 = scalar_lea.vmem %s40_s26, 3072  ;;  %p2581_p4 = scmp.lt.s32.totalorder %s40_s26, %s40_s26 }
   0xb   :  { %p2577_p3 = scmp.ne.s32.totalorder %s40_s26, %s2576_s17  ;;  %p2582_p5 = scmp.lt.s32.totalorder %s2576_s17, %s2576_s17 }
   0xd   :  { %p2583_p6 = por %p2582_p5, %p2581_p4 }
   0xf   :  { %p2584_p7 = pnand %p2583_p6, %p2577_p3 }
  0x11   :  { %2587 = shalt.err (!%p2584_p7)
}
  0x12   :  { %s2707_s18 = smov 192   ;;  %s2708_s19 = smov 12  }
  0x13   :  { %45 = dma.hbm_to_vmem [thread:$0]  %s3159_s1, 3072, %s40_s26, [#allocation7], %s2707_s18, %s2707_s18, %s2708_s19  }
  0x14   :  { %s2709_s22 = smov [#allocation9]   ;;  %s2710_s24 = smov [#allocation3]  }
  0x15   :  { %s67_s23 = sshll.u32 %s2709_s22, 4  ;;  %s27_s25 = sshll.u32 %s2710_s24, 4  ;;  %s68_s23 = int_to_ptr.vmem [resolvable:$true] %s67_s23  ;;  %s28_s25 = int_to_ptr.vmem [resolvable:$true] %s27_s25 }
  0x16   :  { %s2588_s29 = scalar_lea.hbm %s3163_s5, 2048 }
  0x17   :  { %p2589_p8 = scmp.ne.s32.totalorder %s3163_s5, %s2588_s29  ;;  %p2592_p9 = scmp.lt.u32.totalorder %s2588_s29, %s3163_s5 }
  0x19   :  { %p2594_p10 = pnand %p2592_p9, %p2589_p8 }
  0x1b   :  { %2597 = shalt.err (!%p2594_p10)
}
  0x1c   :  { %s2598_s1 = scalar_lea.vmem %s68_s23, 2048  ;;  %p2603_p12 = scmp.lt.s32.totalorder %s68_s23, %s68_s23 }
  0x1d   :  { %p2599_p11 = scmp.ne.s32.totalorder %s68_s23, %s2598_s1  ;;  %p2604_p13 = scmp.lt.s32.totalorder %s2598_s1, %s2598_s1 }
  0x1f   :  { %p2605_p0 = por %p2604_p13, %p2603_p12 }
  0x21   :  { %p2606_p1 = pnand %p2605_p0, %p2599_p11 }
  0x23   :  { %2609 = shalt.err (!%p2606_p1)
}
  0x24   :  { %s2711_s26 = smov 128   ;;  %s2712_s17 = smov 8  }
  0x25   :  { %73 = dma.hbm_to_vmem [thread:$0]  %s3163_s5, 2048, %s68_s23, [#allocation10], %s2711_s26, %s2711_s26, %s2712_s17  }
  0x26   :  { %s2610_s22 = scalar_lea.hbm %s3158_s0, 512 }
  0x27   :  { %p2611_p2 = scmp.ne.s32.totalorder %s3158_s0, %s2610_s22  ;;  %p2614_p3 = scmp.lt.u32.totalorder %s2610_s22, %s3158_s0 }
  0x29   :  { %p2616_p4 = pnand %p2614_p3, %p2611_p2 }
  0x2b   :  { %2619 = shalt.err (!%p2616_p4)
}
  0x2c   :  { %s2620_s30 = scalar_lea.vmem %s28_s25, 512  ;;  %p2625_p6 = scmp.lt.s32.totalorder %s28_s25, %s28_s25 }
  0x2d   :  { %p2621_p5 = scmp.ne.s32.totalorder %s28_s25, %s2620_s30  ;;  %p2626_p7 = scmp.lt.s32.totalorder %s2620_s30, %s2620_s30 }
  0x2f   :  { %p2627_p8 = por %p2626_p7, %p2625_p6 }
  0x31   :  { %p2628_p9 = pnand %p2627_p8, %p2621_p5 }
  0x33   :  { %2631 = shalt.err (!%p2628_p9)
}
  0x34   :  { %33 = dma.hbm_to_vmem [thread:$0]  %s3158_s0, 512, %s28_s25, [#allocation4], %s2711_s26, %s2711_s26, %s2712_s17  }
  0x35   :  { %s2713_s14 = smov [#allocation8]   ;;  %s2632_s18 = scalar_lea.hbm %s3161_s3, 1024 }
  0x36   :  { %s53_s15 = sshll.u32 %s2713_s14, 4  ;;  %p2633_p10 = scmp.ne.s32.totalorder %s3161_s3, %s2632_s18  ;;  %s54_s15 = int_to_ptr.vmem [resolvable:$true] %s53_s15 }
  0x37   :  { %p2636_p11 = scmp.lt.u32.totalorder %s2632_s18, %s3161_s3 }
  0x39   :  { %p2638_p12 = pnand %p2636_p11, %p2633_p10 }
  0x3b   :  { %2641 = shalt.err (!%p2638_p12)
}
  0x3c   :  { %s2642_s24 = scalar_lea.vmem %s54_s15, 1024  ;;  %p2647_p0 = scmp.lt.s32.totalorder %s54_s15, %s54_s15 }
  0x3d   :  { %p2643_p13 = scmp.ne.s32.totalorder %s54_s15, %s2642_s24  ;;  %p2648_p1 = scmp.lt.s32.totalorder %s2642_s24, %s2642_s24 }
  0x3f   :  { %p2649_p2 = por %p2648_p1, %p2647_p0 }
  0x41   :  { %p2650_p3 = pnand %p2649_p2, %p2643_p13 }
  0x43   :  { %2653 = shalt.err (!%p2650_p3)
}
  0x44   :  { %s2714_s0 = smov 64   ;;  %s2715_s25 = smov 4  }
  0x45   :  { %59 = dma.hbm_to_vmem [thread:$0]  %s3161_s3, 1024, %s54_s15, [#allocation7], %s2714_s0, %s2714_s0, %s2715_s25  }
  0x46   :  { %s2716_s29 = smov [#allocation11]   ;;  %s2654_s14 = scalar_lea.hbm %s3165_s7, 2048 }
  0x47   :  { %s81_s30 = sshll.u32 %s2716_s29, 4  ;;  %p2655_p4 = scmp.ne.s32.totalorder %s3165_s7, %s2654_s14  ;;  %s82_s30 = int_to_ptr.vmem [resolvable:$true] %s81_s30 }
  0x48   :  { %p2658_p5 = scmp.lt.u32.totalorder %s2654_s14, %s3165_s7 }
  0x4a   :  { %p2660_p6 = pnand %p2658_p5, %p2655_p4 }
  0x4c   :  { %2663 = shalt.err (!%p2660_p6)
}
  0x4d   :  { %s2664_s20 = scalar_lea.vmem %s82_s30, 2048  ;;  %p2669_p8 = scmp.lt.s32.totalorder %s82_s30, %s82_s30 }
  0x4e   :  { %p2665_p7 = scmp.ne.s32.totalorder %s82_s30, %s2664_s20  ;;  %p2670_p9 = scmp.lt.s32.totalorder %s2664_s20, %s2664_s20 }
  0x50   :  { %p2671_p10 = por %p2670_p9, %p2669_p8 }
  0x52   :  { %p2672_p11 = pnand %p2671_p10, %p2665_p7 }
  0x54   :  { %2675 = shalt.err (!%p2672_p11)
}
  0x55   :  { %87 = dma.hbm_to_vmem [thread:$0]  %s3165_s7, 2048, %s82_s30, [#allocation10], %s2714_s0, %s2714_s0, %s2715_s25  }
  0x56   :  { %2698 = dma.done.wait [#allocation4], 512  }
  0x57   :  { %2699 = vsyncadd [#allocation4], 4294966784 }
  0x58   :  { %2700 = dma.done.wait [#allocation7], 4096  }
  0x59   :  { %2701 = vsyncadd [#allocation7], 4294963200 }
  0x5a   :  { %2702 = dma.done.wait [#allocation10], 4096  }
  0x5b   :  { %2703 = vsyncadd [#allocation10], 4294963200  ;;  %v2717_v0 = vmov 0   ;;  %v2402_v1 = vld [vmem:[#allocation6 + $0x4] ss:$12 sps:$4 sm:$0xff]   ;;  %v115_v10 = vld [vmem:[#allocation3 + $0x8] sm:$0xff]  ;;  %v154_v24 = vlaneseq }
  0x5c   :  { %329 = vmatprep.mubr.bf16.mxu0 %v2717_v0  ;;  %v2404_v2 = vld [vmem:[#allocation6] ss:$12 sps:$4 sm:$0xff]   ;;  %297 = vmatprep.subr.bf16.mxu0 %v2402_v1  ;;  %v2405_v3 = vld [vmem:[#allocation6 + $0x1c] ss:$12 sps:$4 sm:$0xff]   ;;  %v2407_v4 = vld [vmem:[#allocation6 + $0x18] ss:$12 sps:$4 sm:$0xff]  }
  0x5d   :  { %298 = vmatpush1.bf16.msra.mxu0 %v2404_v2  ;;  %v2408_v5 = vld [vmem:[#allocation6 + $0x34] ss:$12 sps:$4 sm:$0xff]   ;;  %v2410_v6 = vld [vmem:[#allocation6 + $0x30] ss:$12 sps:$4 sm:$0xff]   ;;  %v2411_v7 = vld [vmem:[#allocation6 + $0x4c] ss:$12 sps:$4 sm:$0xff]  }
  0x5e   :  { %299 = vmatprep.subr.bf16.mxu0 %v2405_v3  ;;  %v114_v8 = vld [vmem:[#allocation3] sm:$0xff]  ;;  %v2413_v9 = vld [vmem:[#allocation6 + $0x48] ss:$12 sps:$4 sm:$0xff]   ;;  %v2422_v17 = vld [vmem:[#allocation6 + $0x90] ss:$12 sps:$4 sm:$0xff]   ;;  %v2718_v23 = vmov 0.0  }
  0x5f   :  { %v2414_v11 = vld [vmem:[#allocation6 + $0x64] ss:$12 sps:$4 sm:$0xff]   ;;  %v118_v12 = vpack.c.bf16 %v115_v10, %v114_v8  ;;  %v2416_v13 = vld [vmem:[#allocation6 + $0x60] ss:$12 sps:$4 sm:$0xff]   ;;  %v2417_v14 = vld [vmem:[#allocation6 + $0x7c] ss:$12 sps:$4 sm:$0xff]  }
  0x60   :  { %v2419_v15 = vld [vmem:[#allocation6 + $0x78] ss:$12 sps:$4 sm:$0xff]   ;;  %v2420_v16 = vld [vmem:[#allocation6 + $0x94] ss:$12 sps:$4 sm:$0xff]   ;;  %vm2719_vm0 = vmmov 0   ;;  %v2871_v25 = vshrl.u32 %v154_v24, 7 }
  0x61   :  { %300 = vmatpush1.bf16.msra.mxu0 %v2407_v4  ;;  %2265 = vmatprep.mubr.bf16.mxu1 %v118_v12  ;;  %v2423_v18 = vld [vmem:[#allocation6 + $0xac] ss:$12 sps:$4 sm:$0xff]   ;;  %v2425_v19 = vld [vmem:[#allocation6 + $0xa8] ss:$12 sps:$4 sm:$0xff]   ;;  %v2877_v27 = vld [vmem:[%s3160_s2] sm:$0x7] }
  0x62   :  { %301 = vmatprep.subr.bf16.mxu0 %v2408_v5  ;;  %v116_v20 = vld [vmem:[#allocation3 + $0x10] sm:$0xff]  ;;  %v117_v21 = vld [vmem:[#allocation3 + $0x18] sm:$0xff]  ;;  %v156_v26 = vsub.s32 0, %v2871_v25  ;;  %v160_v28 = vsub.s32 1, %v2871_v25  ;;  %vm405_vm1 = vcmask 261120   ;;  %vm500_vm2 = vcmask 130048  }
  0x63   :  { %v2865_v22 = vpack.c.bf16 %v117_v21, %v116_v20  ;;  %v2426_v53 = vld [vmem:[#allocation6 + $0x8] ss:$12 sps:$4 sm:$0xff]   ;;  %v2427_v54 = vld [vmem:[#allocation6 + $0x20] ss:$12 sps:$4 sm:$0xff]   ;;  %v2428_v55 = vld [vmem:[#allocation6 + $0x38] ss:$12 sps:$4 sm:$0xff]  }
  0x64   :  { %v157_v29 = vrot.slane %v2877_v27, %v156_v26  ;;  %v161_v31 = vrot.slane %v2877_v27, %v160_v28  ;;  %2249 = vmatprep.subr.bf16.mxu1 %v2426_v53  ;;  %v2429_v56 = vld [vmem:[#allocation6 + $0x50] ss:$12 sps:$4 sm:$0xff]   ;;  %v2430_v57 = vld [vmem:[#allocation6 + $0x68] ss:$12 sps:$4 sm:$0xff]   ;;  %v2431_v58 = vld [vmem:[#allocation6 + $0x80] ss:$12 sps:$4 sm:$0xff]  }
  0x65   :  { %302 = vmatpush1.bf16.msra.mxu0 %v2410_v6  ;;  %2250 = vmatpush3.bf16.msra.mxu1 %v2426_v53  ;;  %v2432_v59 = vld [vmem:[#allocation6 + $0x98] ss:$12 sps:$4 sm:$0xff]   ;;  %v2433_v60 = vld [vmem:[#allocation6 + $0xb0] ss:$12 sps:$4 sm:$0xff]   ;;  %s2720_s2 = smov 96   ;;  %s2721_s22 = smov 32  }
  0x66   :  { %303 = vmatprep.subr.bf16.mxu0 %v2411_v7  ;;  %2251 = vmatprep.subr.bf16.mxu1 %v2427_v54  ;;  %vm903_vm3 = vcmask 523520   ;;  %vm1166_vm4 = vcmask 785920   ;;  %vm1429_vm5 = vcmask 1048320   ;;  %s2722_s14 = smov [#allocation12]  }
  0x69   :  { %304 = vmatpush1.bf16.msra.mxu0 %v2413_v9  ;;  %2252 = vmatpush3.bf16.msra.mxu1 %v2427_v54 }
  0x6a   :  { %305 = vmatprep.subr.bf16.mxu0 %v2414_v11  ;;  %2253 = vmatprep.subr.bf16.mxu1 %v2428_v55 }
  0x6d   :  { %306 = vmatpush1.bf16.msra.mxu0 %v2416_v13  ;;  %2254 = vmatpush3.bf16.msra.mxu1 %v2428_v55 }
  0x6e   :  { %307 = vmatprep.subr.bf16.mxu0 %v2417_v14  ;;  %2255 = vmatprep.subr.bf16.mxu1 %v2429_v56 }
  0x71   :  { %308 = vmatpush1.bf16.msra.mxu0 %v2419_v15  ;;  %2256 = vmatpush3.bf16.msra.mxu1 %v2429_v56 }
  0x72   :  { %309 = vmatprep.subr.bf16.mxu0 %v2420_v16  ;;  %2257 = vmatprep.subr.bf16.mxu1 %v2430_v57 }
  0x75   :  { %310 = vmatpush1.bf16.msra.mxu0 %v2422_v17  ;;  %2258 = vmatpush3.bf16.msra.mxu1 %v2430_v57 }
  0x76   :  { %311 = vmatprep.subr.bf16.mxu0 %v2423_v18  ;;  %2259 = vmatprep.subr.bf16.mxu1 %v2431_v58 }
  0x79   :  { %312 = vmatpush1.bf16.msra.mxu0 %v2425_v19  ;;  %2260 = vmatpush3.bf16.msra.mxu1 %v2431_v58 }
  0x7a   :  { %2269 = vmatprep.subr.bf16.mxu0 %v2718_v23  ;;  %2261 = vmatprep.subr.bf16.mxu1 %v2432_v59 }
  0x7c   :  { %330 = vmatmul.mubr.bf16.vlgmr.msra.gmra.mrb[0].mxu0 %v118_v12 }
  0x7d   :  { %339 = vmatprep.mubr.bf16.mxu0 %v2717_v0  ;;  %2262 = vmatpush3.bf16.msra.mxu1 %v2432_v59 }
  0x7e   :  { %2263 = vmatprep.subr.bf16.mxu1 %v2433_v60 }
  0x81   :  { %2264 = vmatpush3.bf16.msra.mxu1 %v2433_v60 }
  0x82   :  { %2281 = vmatprep.subr.bf16.mxu1 %v2718_v23 }
  0x84   :  { %340 = vmatmul.mubr.bf16.gmra.mrb[4].mxu0 %v2865_v22  ;;  %2266 = vmatmul.mubr.bf16.vlgmr.msra.gmra.mrb[0].mxu1 %v2865_v22 }
  0x85   :  { %2271 = vmatprep.mubr.msk.bf16.mxu0 %vm2719_vm0, %v2718_v23  ;;  %2283 = vmatprep.mubr.msk.bf16.mxu1 %vm2719_vm0, %v2718_v23 }
 0x14f   :  { %v331_v30 = vpop.f32.mrb[0].mxu0 }
 0x150   :  { %v333_v32 = vpop.f32.mrb[1].mxu0  ;;  %v332_v34 = vadd.f32 %v331_v30, %v157_v29  ;;  %v164_v30 = vsub.s32 2, %v2871_v25 }
 0x151   :  { %v335_v33 = vpop.f32.mrb[2].mxu0  ;;  %v334_v37 = vadd.f32 %v333_v32, %v161_v31 }
 0x152   :  { %v336_v35 = vadd.f32 %v335_v33, %v157_v29  ;;  %v337_v36 = vpop.f32.mrb[3].mxu0  ;;  %v165_v33 = vrot.slane %v2877_v27, %v164_v30 }
 0x153   :  { %v338_v38 = vadd.f32 %v337_v36, %v161_v31 }
 0x154   :  { %v2886_v39 = vpack.c.bf16 %v336_v35, %v332_v34 }
 0x155   :  { %v2888_v40 = vpack.c.bf16 %v338_v38, %v334_v37 }
 0x157   :  { %v341_v41 = vpop.f32.mrb[4].mxu0  ;;  %v410_v42 = vsel %vm405_vm1, %v2888_v40, 0 }
 0x158   :  { %v342_v43 = vadd.f32 %v341_v41, %v157_v29  ;;  %v343_v44 = vpop.f32.mrb[5].mxu0  ;;  %2270 = vmatpush3.bf16.xpose.msra.mxu0 %v410_v42 }
 0x159   :  { %v344_v45 = vadd.f32 %v343_v44, %v161_v31  ;;  %v345_v46 = vpop.f32.mrb[6].mxu0  ;;  %2275 = vmatprep.subr.bf16.mxu0 %v2718_v23 }
 0x15a   :  { %v346_v47 = vadd.f32 %v345_v46, %v157_v29  ;;  %v347_v48 = vpop.f32.mrb[7].mxu0 }
 0x15b   :  { %v348_v49 = vadd.f32 %v347_v48, %v161_v31  ;;  %v2267_v31 = vpop.f32.mrb[0].mxu1 }
 0x15c   :  { %v2893_v50 = vpack.c.bf16 %v346_v47, %v342_v43  ;;  %v384_v32 = vpop.f32.mrb[1].mxu1  ;;  %v393_v41 = vadd.f32 %v2267_v31, %v165_v33 }
 0x15d   :  { %v2895_v51 = vpack.c.bf16 %v348_v49, %v344_v45  ;;  %v2268_v34 = vpop.f32.mrb[2].mxu1  ;;  %v385_v36 = vadd.f32 %v384_v32, %v165_v33 }
 0x15e   :  { %v387_v35 = vpop.f32.mrb[3].mxu1  ;;  %v396_v42 = vadd.f32 %v2268_v34, %v165_v33 }
 0x15f   :  { %2272 = vmatmul.mubr.msk.bf16.vlgmr.msra.gmra.mrb[8].mxu0 %vm405_vm1, %v2886_v39  ;;  %v457_v52 = vsel %vm405_vm1, %v2895_v51, 0  ;;  %v388_v37 = vadd.f32 %v387_v35, %v165_v33 }
 0x160   :  { %2276 = vmatpush3.bf16.xpose.msra.mxu0 %v457_v52  ;;  %2277 = vmatprep.mubr.msk.bf16.mxu0 %vm2719_vm0, %v2718_v23  ;;  %v2929_v27 = vpack.c.bf16 %v396_v42, %v393_v41 }
 0x161   :  { %2287 = vmatprep.subr.bf16.mxu0 %v2718_v23  ;;  %v2923_v38 = vpack.c.bf16 %v388_v37, %v385_v36 }
 0x163   :  { %2282 = vmatpush3.bf16.msra.mxu1 %v2923_v38 }
 0x164   :  { %2293 = vmatprep.subr.bf16.mxu1 %v2718_v23 }
 0x167   :  { %2278 = vmatmul.mubr.msk.bf16.vlgmr.msra.gmra.mrb[12].mxu0 %vm405_vm1, %v2893_v50 }
 0x168   :  { %2289 = vmatprep.mubr.msk.bf16.mxu0 %vm2719_vm0, %v2718_v23  ;;  %2288 = vmatpush3.bf16.msra.mxu0 %v2929_v27 }
 0x169   :  { %2299 = vmatprep.subr.bf16.mxu0 %v2718_v23 }
 0x232   :  { %v446_v61 = vpop.f32.mrb[8].mxu0 }
 0x233   :  { %v2273_v62 = vpop.f32.mrb[9].mxu0  ;;  %v501_v63 = vsel %vm500_vm2, %v446_v61, -inf }
 0x234   :  { %502 = vmax.xlane.f32.xlu0 %v501_v63  ;;  %v449_v1 = vpop.f32.mrb[10].mxu0 }
 0x235   :  { %v2274_v2 = vpop.f32.mrb[11].mxu0  ;;  %v504_v3 = vsel %vm500_vm2, %v449_v1, -inf }
 0x238   :  { %505 = vmax.xlane.f32.xlu0 %v504_v3 }
 0x23a   :  { %v493_v4 = vpop.f32.mrb[12].mxu0 }
 0x23b   :  { %v507_v5 = vsel %vm500_vm2, %v493_v4, -inf  ;;  %v2279_v6 = vpop.f32.mrb[13].mxu0 }
 0x23c   :  { %508 = vmax.xlane.f32.xlu1 %v507_v5  ;;  %v496_v7 = vpop.f32.mrb[14].mxu0 }
 0x23d   :  { %v510_v8 = vsel %vm500_vm2, %v496_v7, -inf  ;;  %v2280_v9 = vpop.f32.mrb[15].mxu0 }
 0x240   :  { %511 = vmax.xlane.f32.xlu1 %v510_v8 }
 0x2c1   :  { %v503_v10 = vpop.xlane.xlu0 %502 }
 0x2c2   :  { %v513_v11 = vsub.f32 %v446_v61, %v503_v10 }
 0x2c4   :  { %v517_v12 = vmul.f32 1.442695, %v513_v11 }
 0x2c5   :  { %v506_v13 = vpop.xlane.xlu0 %505 }
 0x2c6   :  { %2482 = vpow2.f32 %v517_v12  ;;  %v514_v14 = vsub.f32 %v449_v1, %v506_v13 }
 0x2c8   :  { %v519_v15 = vmul.f32 1.442695, %v514_v14 }
 0x2c9   :  { %v509_v16 = vpop.xlane.xlu1 %508 }
 0x2ca   :  { %2484 = vpow2.f32 %v519_v15  ;;  %v515_v17 = vsub.f32 %v493_v4, %v509_v16 }
 0x2cc   :  { %v521_v18 = vmul.f32 1.442695, %v515_v17 }
 0x2cd   :  { %v512_v43 = vpop.xlane.xlu1 %511 }
 0x2ce   :  { %2486 = vpow2.f32 %v521_v18  ;;  %v516_v44 = vsub.f32 %v496_v7, %v512_v43 }
 0x2d0   :  { %v2483_v19 = vpop.eup %2482  ;;  %v523_v45 = vmul.f32 1.442695, %v516_v44 }
 0x2d1   :  { %v525_v20 = vsel %vm500_vm2, %v2483_v19, 0.0 }
 0x2d2   :  { %526 = vadd.xlane.f32.xlu0 %v525_v20  ;;  %2488 = vpow2.f32 %v523_v45 }
 0x2d4   :  { %v2485_v21 = vpop.eup %2484 }
 0x2d5   :  { %v528_v22 = vsel %vm500_vm2, %v2485_v21, 0.0 }
 0x2d6   :  { %529 = vadd.xlane.f32.xlu1 %v528_v22 }
 0x2d8   :  { %v2487_v24 = vpop.eup %2486 }
 0x2d9   :  { %v531_v29 = vsel %vm500_vm2, %v2487_v24, 0.0 }
 0x2da   :  { %532 = vadd.xlane.f32.xlu0 %v531_v29 }
 0x2dc   :  { %v2489_v46 = vpop.eup %2488 }
 0x2dd   :  { %v534_v47 = vsel %vm500_vm2, %v2489_v46, 0.0 }
 0x2e7   :  { %696 = vrot.lane.b32.xlu1 %v2895_v51, %s2720_s2 }
 0x2f0   :  { %643 = vrot.lane.b32.xlu0 %v2888_v40, %s2720_s2 }
 0x30b   :  { %535 = vadd.xlane.f32.xlu1 %v534_v47 }
 0x31c   :  { %640 = vrot.lane.b32.xlu1 %v2886_v39, %s2720_s2 }
 0x320   :  { %693 = vrot.lane.b32.xlu1 %v2893_v50, %s2720_s2 }
 0x35f   :  { %v527_v48 = vpop.xlane.xlu0 %526 }
 0x360   :  { %2490 = vrcp.f32 %v527_v48 }
 0x363   :  { %v530_v49 = vpop.xlane.xlu1 %529 }
 0x364   :  { %2492 = vrcp.f32 %v530_v49 }
 0x367   :  { %v533_v52 = vpop.xlane.xlu0 %532  ;;  %v697_v60 = vpop.permute.xlu1 %696 }
 0x368   :  { %2494 = vrcp.f32 %v533_v52  ;;  %v702_v5 = vsel %vm405_vm1, %v697_v60, 0 }
 0x36a   :  { %v2491_v53 = vpop.eup %2490 }
 0x36b   :  { %v541_v55 = vmul.f32 %v2491_v53, %v2483_v19  ;;  %v644_v57 = vpop.permute.xlu0 %643 }
 0x36c   :  { %v649_v59 = vsel %vm405_vm1, %v644_v57, 0 }
 0x36e   :  { %v2493_v54 = vpop.eup %2492 }
 0x36f   :  { %v542_v56 = vmul.f32 %v2493_v54, %v2485_v21 }
 0x371   :  { %v545_v58 = vpack.c.bf16 %v542_v56, %v541_v55 }
 0x372   :  { %v2495_v63 = vpop.eup %2494 }
 0x373   :  { %2284 = vmatmul.mubr.msk.bf16.vlgmr.msra.gmra.mrb[4].mxu1 %vm500_vm2, %v545_v58  ;;  %v543_v2 = vmul.f32 %v2495_v63, %v2487_v24 }
 0x374   :  { %2294 = vmatpush3.bf16.xpose.msra.mxu1 %v649_v59  ;;  %2295 = vmatprep.mubr.msk.bf16.mxu1 %vm2719_vm0, %v2718_v23 }
 0x375   :  { %2305 = vmatprep.subr.bf16.mxu1 %v2718_v23 }
 0x398   :  { %v536_v61 = vpop.xlane.xlu1 %535 }
 0x399   :  { %2496 = vrcp.f32 %v536_v61 }
 0x39c   :  { %v641_v62 = vpop.permute.xlu1 %640 }
 0x39d   :  { %2296 = vmatmul.mubr.msk.bf16.vlgmr.msra.gmra.mrb[8].mxu1 %vm405_vm1, %v641_v62 }
 0x39e   :  { %2307 = vmatprep.mubr.msk.bf16.mxu1 %vm2719_vm0, %v2718_v23 }
 0x3a0   :  { %v694_v6 = vpop.permute.xlu1 %693 }
 0x3a3   :  { %v2497_v1 = vpop.eup %2496 }
 0x3a4   :  { %v544_v3 = vmul.f32 %v2497_v1, %v2489_v46 }
 0x3a6   :  { %v546_v4 = vpack.c.bf16 %v544_v3, %v543_v2 }
 0x3a8   :  { %2290 = vmatmul.mubr.msk.bf16.vlgmr.msra.gmra.mrb[16].mxu0 %vm500_vm2, %v546_v4 }
 0x3a9   :  { %2300 = vmatpush3.bf16.xpose.msra.mxu0 %v702_v5  ;;  %2301 = vmatprep.mubr.msk.bf16.mxu0 %vm2719_vm0, %v2718_v23 }
 0x3aa   :  { %2311 = vmatprep.subr.bf16.mxu0 %v2718_v23 }
 0x3b0   :  { %2302 = vmatmul.mubr.msk.bf16.vlgmr.msra.gmra.mrb[20].mxu0 %vm405_vm1, %v694_v6 }
 0x3b1   :  { %2313 = vmatprep.mubr.msk.bf16.mxu0 %vm2719_vm0, %v2718_v23 }
 0x446   :  { %v584_v7 = vpop.f32.mrb[4].mxu1 }
 0x447   :  { %635 = vst.msk [vmem:[#allocation2] sm:$0xff] %vm405_vm1, %v584_v7  ;;  %v2285_v8 = vpop.f32.mrb[5].mxu1 }
 0x448   :  { %v587_v9 = vpop.f32.mrb[6].mxu1 }
 0x449   :  { %636 = vst.msk [vmem:[#allocation2 + $0x8] sm:$0xff] %vm405_vm1, %v587_v9  ;;  %v2286_v10 = vpop.f32.mrb[7].mxu1 }
 0x470   :  { %v685_v11 = vpop.f32.mrb[8].mxu1 }
 0x471   :  { %v2297_v12 = vpop.f32.mrb[9].mxu1  ;;  %v745_v13 = vsel %vm500_vm2, %v685_v11, -inf }
 0x472   :  { %746 = vmax.xlane.f32.xlu0 %v745_v13  ;;  %v688_v14 = vpop.f32.mrb[10].mxu1 }
 0x473   :  { %v2298_v15 = vpop.f32.mrb[11].mxu1  ;;  %v748_v16 = vsel %vm500_vm2, %v688_v14, -inf }
 0x474   :  { %749 = vmax.xlane.f32.xlu1 %v748_v16 }
 0x47b   :  { %v628_v17 = vpop.f32.mrb[16].mxu0 }
 0x47c   :  { %637 = vst.msk [vmem:[#allocation2 + $0x10] sm:$0xff] %vm405_vm1, %v628_v17  ;;  %v2291_v18 = vpop.f32.mrb[17].mxu0 }
 0x47d   :  { %v631_v19 = vpop.f32.mrb[18].mxu0 }
 0x47e   :  { %638 = vst.msk [vmem:[#allocation2 + $0x18] sm:$0xff] %vm405_vm1, %v631_v19  ;;  %v2292_v20 = vpop.f32.mrb[19].mxu0 }
 0x483   :  { %v738_v21 = vpop.f32.mrb[20].mxu0 }
 0x484   :  { %v2303_v22 = vpop.f32.mrb[21].mxu0  ;;  %v751_v24 = vsel %vm500_vm2, %v738_v21, -inf }
 0x485   :  { %752 = vmax.xlane.f32.xlu0 %v751_v24  ;;  %v741_v29 = vpop.f32.mrb[22].mxu0 }
 0x486   :  { %v2304_v30 = vpop.f32.mrb[23].mxu0  ;;  %v754_v31 = vsel %vm500_vm2, %v741_v29, -inf }
 0x489   :  { %755 = vmax.xlane.f32.xlu0 %v754_v31 }
 0x4ff   :  { %v747_v32 = vpop.xlane.xlu0 %746 }
 0x500   :  { %v757_v33 = vsub.f32 %v685_v11, %v747_v32 }
 0x501   :  { %v750_v34 = vpop.xlane.xlu1 %749 }
 0x502   :  { %v761_v35 = vmul.f32 1.442695, %v757_v33  ;;  %v758_v36 = vsub.f32 %v688_v14, %v750_v34 }
 0x504   :  { %2498 = vpow2.f32 %v761_v35  ;;  %v763_v37 = vmul.f32 1.442695, %v758_v36 }
 0x506   :  { %2500 = vpow2.f32 %v763_v37 }
 0x50e   :  { %v2499_v41 = vpop.eup %2498 }
 0x50f   :  { %v769_v42 = vsel %vm500_vm2, %v2499_v41, 0.0 }
 0x510   :  { %v2501_v43 = vpop.eup %2500  ;;  %770 = vadd.xlane.f32.xlu0 %v769_v42 }
 0x511   :  { %v772_v44 = vsel %vm500_vm2, %v2501_v43, 0.0 }
 0x512   :  { %773 = vadd.xlane.f32.xlu1 %v772_v44  ;;  %v753_v45 = vpop.xlane.xlu0 %752 }
 0x513   :  { %v759_v46 = vsub.f32 %v738_v21, %v753_v45 }
 0x515   :  { %v765_v47 = vmul.f32 1.442695, %v759_v46 }
 0x516   :  { %v756_v52 = vpop.xlane.xlu0 %755 }
 0x517   :  { %2502 = vpow2.f32 %v765_v47  ;;  %v760_v53 = vsub.f32 %v741_v29, %v756_v52 }
 0x519   :  { %v767_v54 = vmul.f32 1.442695, %v760_v53 }
 0x51b   :  { %2504 = vpow2.f32 %v767_v54 }
 0x521   :  { %v2503_v48 = vpop.eup %2502 }
 0x522   :  { %v775_v49 = vsel %vm500_vm2, %v2503_v48, 0.0 }
 0x523   :  { %840 = vrot.lane.b32.xlu1 %v2929_v27, %s2720_s2  ;;  %776 = vadd.xlane.f32.xlu0 %v775_v49 }
 0x525   :  { %v2505_v55 = vpop.eup %2504 }
 0x526   :  { %v778_v56 = vsel %vm500_vm2, %v2505_v55, 0.0 }
 0x527   :  { %910 = vrot.lane.b32.xlu1 %v2888_v40, %s2714_s0 }
 0x539   :  { %792 = vrot.lane.b32.xlu0 %v2923_v38, %s2720_s2 }
 0x53d   :  { %908 = vrot.lane.b32.xlu0 %v2886_v39, %s2714_s0 }
 0x54b   :  { %779 = vadd.xlane.f32.xlu1 %v778_v56 }
 0x55c   :  { %961 = vrot.lane.b32.xlu1 %v2895_v51, %s2714_s0 }
 0x560   :  { %959 = vrot.lane.b32.xlu1 %v2893_v50, %s2714_s0 }
 0x59d   :  { %v771_v59 = vpop.xlane.xlu0 %770 }
 0x59f   :  { %v774_v57 = vpop.xlane.xlu1 %773 }
 0x5a0   :  { %2506 = vrcp.f32 %v774_v57 }
 0x5a1   :  { %2508 = vrcp.f32 %v771_v59 }
 0x5a3   :  { %v841_v58 = vpop.permute.xlu1 %840 }
 0x5a4   :  { %2312 = vmatpush3.bf16.msra.mxu0 %v841_v58 }
 0x5a5   :  { %2323 = vmatprep.subr.bf16.mxu0 %v2718_v23 }
 0x5a7   :  { %v911_v4 = vpop.permute.xlu1 %910 }
 0x5a8   :  { %v916_v5 = vsel %vm405_vm1, %v911_v4, 0 }
 0x5aa   :  { %v2507_v60 = vpop.eup %2506 }
 0x5ab   :  { %v2509_v62 = vpop.eup %2508  ;;  %v786_v63 = vmul.f32 %v2507_v60, %v2501_v43 }
 0x5ac   :  { %v785_v1 = vmul.f32 %v2509_v62, %v2499_v41 }
 0x5ae   :  { %v789_v3 = vpack.c.bf16 %v786_v63, %v785_v1 }
 0x5b0   :  { %v777_v61 = vpop.xlane.xlu0 %776 }
 0x5b1   :  { %2510 = vrcp.f32 %v777_v61 }
 0x5b4   :  { %v793_v2 = vpop.permute.xlu0 %792 }
 0x5b5   :  { %2306 = vmatpush3.bf16.msra.mxu1 %v793_v2 }
 0x5b6   :  { %2317 = vmatprep.subr.bf16.mxu1 %v2718_v23 }
 0x5b8   :  { %2308 = vmatmul.mubr.msk.bf16.vlgmr.msra.gmra.mrb[12].mxu1 %vm500_vm2, %v789_v3  ;;  %v909_v6 = vpop.permute.xlu0 %908 }
 0x5b9   :  { %2319 = vmatprep.mubr.msk.bf16.mxu1 %vm2719_vm0, %v2718_v23 }
 0x5bb   :  { %v2511_v8 = vpop.eup %2510 }
 0x5bc   :  { %v787_v10 = vmul.f32 %v2511_v8, %v2503_v48 }
 0x5be   :  { %2318 = vmatpush3.bf16.xpose.msra.mxu1 %v916_v5 }
 0x5bf   :  { %2329 = vmatprep.subr.bf16.mxu1 %v2718_v23 }
 0x5c5   :  { %2320 = vmatmul.mubr.msk.bf16.vlgmr.msra.gmra.mrb[16].mxu1 %vm405_vm1, %v909_v6 }
 0x5c6   :  { %2331 = vmatprep.mubr.msk.bf16.mxu1 %vm2719_vm0, %v2718_v23 }
 0x5d8   :  { %v780_v7 = vpop.xlane.xlu1 %779 }
 0x5d9   :  { %2512 = vrcp.f32 %v780_v7 }
 0x5dc   :  { %v962_v12 = vpop.permute.xlu1 %961 }
 0x5dd   :  { %v967_v14 = vsel %vm405_vm1, %v962_v12, 0 }
 0x5e0   :  { %v960_v15 = vpop.permute.xlu1 %959 }
 0x5e3   :  { %v2513_v9 = vpop.eup %2512 }
 0x5e4   :  { %v788_v11 = vmul.f32 %v2513_v9, %v2505_v55 }
 0x5e6   :  { %v790_v13 = vpack.c.bf16 %v788_v11, %v787_v10 }
 0x5e8   :  { %2314 = vmatmul.mubr.msk.bf16.vlgmr.msra.gmra.mrb[24].mxu0 %vm500_vm2, %v790_v13 }
 0x5e9   :  { %2324 = vmatpush3.bf16.xpose.msra.mxu0 %v967_v14  ;;  %2325 = vmatprep.mubr.msk.bf16.mxu0 %vm2719_vm0, %v2718_v23 }
 0x5ea   :  { %2335 = vmatprep.subr.bf16.mxu0 %v2718_v23 }
 0x5f0   :  { %2326 = vmatmul.mubr.msk.bf16.vlgmr.msra.gmra.mrb[28].mxu0 %vm405_vm1, %v960_v15 }
 0x5f1   :  { %2337 = vmatprep.mubr.msk.bf16.mxu0 %vm2719_vm0, %v2718_v23 }
 0x68b   :  { %v2996_v16 = vpop.f32.mrb[12].mxu1 }
 0x68c   :  { %v2309_v17 = vpop.f32.mrb[13].mxu1 }
 0x68d   :  { %v2998_v18 = vpop.f32.mrb[14].mxu1 }
 0x68e   :  { %v2310_v19 = vpop.f32.mrb[15].mxu1 }
 0x698   :  { %v952_v20 = vpop.f32.mrb[16].mxu1 }
 0x699   :  { %v2321_v21 = vpop.f32.mrb[17].mxu1  ;;  %v1010_v22 = vsel %vm500_vm2, %v952_v20, -inf }
 0x69a   :  { %1011 = vmax.xlane.f32.xlu0 %v1010_v22  ;;  %v955_v24 = vpop.f32.mrb[18].mxu1 }
 0x69b   :  { %v2322_v29 = vpop.f32.mrb[19].mxu1  ;;  %v1013_v30 = vsel %vm500_vm2, %v955_v24, -inf }
 0x69c   :  { %1014 = vmax.xlane.f32.xlu1 %v1013_v30 }
 0x6bb   :  { %v3002_v31 = vpop.f32.mrb[24].mxu0 }
 0x6bc   :  { %v2315_v32 = vpop.f32.mrb[25].mxu0 }
 0x6bd   :  { %v3004_v33 = vpop.f32.mrb[26].mxu0 }
 0x6be   :  { %v2316_v34 = vpop.f32.mrb[27].mxu0 }
 0x6c3   :  { %v1003_v35 = vpop.f32.mrb[28].mxu0 }
 0x6c4   :  { %v2327_v36 = vpop.f32.mrb[29].mxu0  ;;  %v1016_v37 = vsel %vm500_vm2, %v1003_v35, -inf }
 0x6c5   :  { %1017 = vmax.xlane.f32.xlu0 %v1016_v37  ;;  %v1006_v41 = vpop.f32.mrb[30].mxu0 }
 0x6c6   :  { %v2328_v42 = vpop.f32.mrb[31].mxu0  ;;  %v1019_v43 = vsel %vm500_vm2, %v1006_v41, -inf }
 0x6c9   :  { %1020 = vmax.xlane.f32.xlu0 %v1019_v43 }
 0x727   :  { %v1012_v44 = vpop.xlane.xlu0 %1011 }
 0x728   :  { %v1022_v45 = vsub.f32 %v952_v20, %v1012_v44 }
 0x729   :  { %v1015_v46 = vpop.xlane.xlu1 %1014 }
 0x72a   :  { %v1026_v47 = vmul.f32 1.442695, %v1022_v45  ;;  %v1023_v48 = vsub.f32 %v955_v24, %v1015_v46 }
 0x72c   :  { %2514 = vpow2.f32 %v1026_v47  ;;  %v1028_v49 = vmul.f32 1.442695, %v1023_v48 }
 0x72e   :  { %2516 = vpow2.f32 %v1028_v49 }
 0x736   :  { %v2515_v52 = vpop.eup %2514 }
 0x737   :  { %v1034_v53 = vsel %vm500_vm2, %v2515_v52, 0.0 }
 0x738   :  { %v2517_v54 = vpop.eup %2516  ;;  %1035 = vadd.xlane.f32.xlu0 %v1034_v53 }
 0x739   :  { %v1037_v55 = vsel %vm500_vm2, %v2517_v54, 0.0 }
 0x73a   :  { %1038 = vadd.xlane.f32.xlu1 %v1037_v55 }
 0x74b   :  { %1103 = vrot.lane.b32.xlu1 %v2929_v27, %s2714_s0 }
 0x74f   :  { %1173 = vrot.lane.b32.xlu1 %v2888_v40, %s2721_s22 }
 0x752   :  { %v1018_v56 = vpop.xlane.xlu0 %1017 }
 0x753   :  { %v1024_v57 = vsub.f32 %v1003_v35, %v1018_v56 }
 0x755   :  { %v1030_v58 = vmul.f32 1.442695, %v1024_v57 }
 0x756   :  { %v1021_v59 = vpop.xlane.xlu0 %1020 }
 0x757   :  { %2518 = vpow2.f32 %v1030_v58  ;;  %v1025_v60 = vsub.f32 %v1006_v41, %v1021_v59 }
 0x759   :  { %v1032_v62 = vmul.f32 1.442695, %v1025_v60 }
 0x75b   :  { %2520 = vpow2.f32 %v1032_v62 }
 0x761   :  { %v2519_v61 = vpop.eup %2518 }
 0x762   :  { %v1040_v63 = vsel %vm500_vm2, %v2519_v61, 0.0 }
 0x763   :  { %1041 = vadd.xlane.f32.xlu0 %v1040_v63 }
 0x765   :  { %v2521_v1 = vpop.eup %2520 }
 0x766   :  { %v1043_v2 = vsel %vm500_vm2, %v2521_v1, 0.0 }
 0x773   :  { %1044 = vadd.xlane.f32.xlu1 %v1043_v2 }
 0x779   :  { %1056 = vrot.lane.b32.xlu0 %v2923_v38, %s2714_s0 }
 0x77d   :  { %1171 = vrot.lane.b32.xlu0 %v2886_v39, %s2721_s22 }
 0x784   :  { %1224 = vrot.lane.b32.xlu1 %v2895_v51, %s2721_s22 }
 0x788   :  { %1222 = vrot.lane.b32.xlu1 %v2893_v50, %s2721_s22 }
 0x7c5   :  { %v1036_v4 = vpop.xlane.xlu0 %1035 }
 0x7c7   :  { %v1039_v40 = vpop.xlane.xlu1 %1038 }
 0x7c8   :  { %2522 = vrcp.f32 %v1039_v40 }
 0x7c9   :  { %2524 = vrcp.f32 %v1036_v4 }
 0x7cb   :  { %v1104_v3 = vpop.permute.xlu1 %1103 }
 0x7cc   :  { %2336 = vmatpush3.bf16.msra.mxu0 %v1104_v3 }
 0x7cd   :  { %2347 = vmatprep.subr.bf16.mxu0 %v2718_v23 }
 0x7cf   :  { %v1174_v50 = vpop.permute.xlu1 %1173 }
 0x7d0   :  { %v1179_v51 = vsel %vm405_vm1, %v1174_v50, 0 }
 0x7d2   :  { %v2523_v5 = vpop.eup %2522 }
 0x7d3   :  { %v2525_v7 = vpop.eup %2524  ;;  %v1051_v8 = vmul.f32 %v2523_v5, %v2517_v54 }
 0x7d4   :  { %v1050_v9 = vmul.f32 %v2525_v7, %v2515_v52 }
 0x7d6   :  { %v1054_v10 = vpack.c.bf16 %v1051_v8, %v1050_v9 }
 0x7f0   :  { %v1042_v6 = vpop.xlane.xlu0 %1041 }
 0x7f1   :  { %2526 = vrcp.f32 %v1042_v6 }
 0x7f4   :  { %v1057_v39 = vpop.permute.xlu0 %1056 }
 0x7f5   :  { %2330 = vmatpush3.bf16.msra.mxu1 %v1057_v39 }
 0x7f6   :  { %2341 = vmatprep.subr.bf16.mxu1 %v2718_v23 }
 0x7f8   :  { %2332 = vmatmul.mubr.msk.bf16.vlgmr.msra.gmra.mrb[20].mxu1 %vm500_vm2, %v1054_v10  ;;  %v1172_v12 = vpop.permute.xlu0 %1171 }
 0x7f9   :  { %2343 = vmatprep.mubr.msk.bf16.mxu1 %vm2719_vm0, %v2718_v23 }
 0x7fb   :  { %v2527_v13 = vpop.eup %2526 }
 0x7fc   :  { %v1052_v15 = vmul.f32 %v2527_v13, %v2519_v61 }
 0x7fe   :  { %2342 = vmatpush3.bf16.xpose.msra.mxu1 %v1179_v51 }
 0x7ff   :  { %2353 = vmatprep.subr.bf16.mxu1 %v2718_v23 }
 0x800   :  { %v1045_v11 = vpop.xlane.xlu1 %1044 }
 0x801   :  { %2528 = vrcp.f32 %v1045_v11 }
 0x804   :  { %v1225_v19 = vpop.permute.xlu1 %1224 }
 0x805   :  { %2344 = vmatmul.mubr.msk.bf16.vlgmr.msra.gmra.mrb[24].mxu1 %vm405_vm1, %v1172_v12  ;;  %v1230_v21 = vsel %vm405_vm1, %v1225_v19, 0 }
 0x806   :  { %2355 = vmatprep.mubr.msk.bf16.mxu1 %vm2719_vm0, %v2718_v23 }
 0x808   :  { %v1223_v22 = vpop.permute.xlu1 %1222 }
 0x80b   :  { %v2529_v14 = vpop.eup %2528 }
 0x80c   :  { %v1053_v17 = vmul.f32 %v2529_v14, %v2521_v1 }
 0x80e   :  { %v1055_v20 = vpack.c.bf16 %v1053_v17, %v1052_v15 }
 0x810   :  { %2338 = vmatmul.mubr.msk.bf16.vlgmr.msra.gmra.mrb[32].mxu0 %vm500_vm2, %v1055_v20 }
 0x811   :  { %2348 = vmatpush3.bf16.xpose.msra.mxu0 %v1230_v21  ;;  %2349 = vmatprep.mubr.msk.bf16.mxu0 %vm2719_vm0, %v2718_v23 }
 0x812   :  { %2359 = vmatprep.subr.bf16.mxu0 %v2718_v23 }
 0x818   :  { %2350 = vmatmul.mubr.msk.bf16.vlgmr.msra.gmra.mrb[36].mxu0 %vm405_vm1, %v1223_v22 }
 0x819   :  { %2361 = vmatprep.mubr.msk.bf16.mxu0 %vm2719_vm0, %v2718_v23 }
 0x8cb   :  { %v1096_v24 = vpop.f32.mrb[20].mxu1 }
 0x8cc   :  { %v2333_v29 = vpop.f32.mrb[21].mxu1 }
 0x8cd   :  { %v1099_v30 = vpop.f32.mrb[22].mxu1 }
 0x8ce   :  { %v2334_v32 = vpop.f32.mrb[23].mxu1 }
 0x8d8   :  { %v1215_v34 = vpop.f32.mrb[24].mxu1 }
 0x8d9   :  { %v2345_v35 = vpop.f32.mrb[25].mxu1  ;;  %v1273_v36 = vsel %vm500_vm2, %v1215_v34, -inf }
 0x8da   :  { %1274 = vmax.xlane.f32.xlu0 %v1273_v36  ;;  %v1218_v37 = vpop.f32.mrb[26].mxu1  ;;  %v2435_v35 = vld [vmem:[#allocation8 + $0x8] sm:$0xff]   ;;  %v2436_v36 = vld [vmem:[#allocation8 + $0x10] sm:$0xff]  }
 0x8db   :  { %v2346_v41 = vpop.f32.mrb[27].mxu1  ;;  %v1276_v42 = vsel %vm500_vm2, %v1218_v37, -inf }
 0x8dc   :  { %1277 = vmax.xlane.f32.xlu1 %v1276_v42  ;;  %v2438_v41 = vld [vmem:[#allocation8 + $0x20] sm:$0xff]   ;;  %v2439_v42 = vld [vmem:[#allocation8 + $0x28] sm:$0xff]  }
 0x8e3   :  { %v1143_v43 = vpop.f32.mrb[32].mxu0 }
 0x8e4   :  { %v2339_v44 = vpop.f32.mrb[33].mxu0 }
 0x8e5   :  { %v1146_v45 = vpop.f32.mrb[34].mxu0 }
 0x8e6   :  { %v2340_v46 = vpop.f32.mrb[35].mxu0 }
 0x8e7   :  { %v2440_v46 = vld [vmem:[#allocation8 + $0x30] sm:$0xff]  }
 0x8eb   :  { %v1266_v47 = vpop.f32.mrb[36].mxu0 }
 0x8ec   :  { %v2351_v23 = vpop.f32.mrb[37].mxu0  ;;  %v1279_v48 = vsel %vm500_vm2, %v1266_v47, -inf }
 0x8ed   :  { %1280 = vmax.xlane.f32.xlu0 %v1279_v48  ;;  %v1269_v49 = vpop.f32.mrb[38].mxu0  ;;  %v2441_v23 = vld [vmem:[#allocation8 + $0x38] sm:$0xff]  }
 0x8ee   :  { %v2352_v52 = vpop.f32.mrb[39].mxu0  ;;  %v1282_v53 = vsel %vm500_vm2, %v1269_v49, -inf }
 0x8f1   :  { %1283 = vmax.xlane.f32.xlu0 %v1282_v53 }
 0x967   :  { %v1275_v54 = vpop.xlane.xlu0 %1274 }
 0x968   :  { %v1285_v55 = vsub.f32 %v1215_v34, %v1275_v54  ;;  %v2434_v34 = vld [vmem:[#allocation8] sm:$0xff]  }
 0x969   :  { %v1278_v56 = vpop.xlane.xlu1 %1277 }
 0x96a   :  { %v1289_v57 = vmul.f32 1.442695, %v1285_v55  ;;  %v1286_v58 = vsub.f32 %v1218_v37, %v1278_v56  ;;  %v2437_v37 = vld [vmem:[#allocation8 + $0x18] sm:$0xff]  }
 0x96c   :  { %2530 = vpow2.f32 %v1289_v57  ;;  %v1291_v59 = vmul.f32 1.442695, %v1286_v58 }
 0x96e   :  { %2532 = vpow2.f32 %v1291_v59 }
 0x976   :  { %v2531_v60 = vpop.eup %2530 }
 0x977   :  { %v1297_v61 = vsel %vm500_vm2, %v2531_v60, 0.0 }
 0x978   :  { %v2533_v62 = vpop.eup %2532  ;;  %1298 = vadd.xlane.f32.xlu0 %v1297_v61 }
 0x979   :  { %v1300_v63 = vsel %vm500_vm2, %v2533_v62, 0.0 }
 0x97a   :  { %1301 = vadd.xlane.f32.xlu1 %v1300_v63  ;;  %v1281_v1 = vpop.xlane.xlu0 %1280 }
 0x97b   :  { %v1287_v2 = vsub.f32 %v1266_v47, %v1281_v1  ;;  %v2123_v1 = vld [vmem:[%s3162_s4] ss:$0 sm:$0xff] }
 0x97d   :  { %v1293_v40 = vmul.f32 1.442695, %v1287_v2 }
 0x97e   :  { %v1284_v3 = vpop.xlane.xlu0 %1283 }
 0x97f   :  { %2534 = vpow2.f32 %v1293_v40  ;;  %v1288_v4 = vsub.f32 %v1269_v49, %v1284_v3 }
 0x981   :  { %v1295_v5 = vmul.f32 1.442695, %v1288_v4 }
 0x983   :  { %2536 = vpow2.f32 %v1295_v5 }
 0x989   :  { %v2535_v6 = vpop.eup %2534 }
 0x98a   :  { %v1303_v7 = vsel %vm500_vm2, %v2535_v6, 0.0 }
 0x98b   :  { %1304 = vadd.xlane.f32.xlu0 %v1303_v7 }
 0x98d   :  { %v2537_v8 = vpop.eup %2536 }
 0x98e   :  { %v1306_v9 = vsel %vm500_vm2, %v2537_v8, 0.0 }
 0x98f   :  { %1307 = vadd.xlane.f32.xlu1 %v1306_v9 }
 0x9a0   :  { %1366 = vrot.lane.b32.xlu1 %v2929_v27, %s2721_s22 }
 0x9a1   :  { %1319 = vrot.lane.b32.xlu0 %v2923_v38, %s2721_s22 }
 0x9a4   :  { %891 = vrot.lane.b32.xlu1 %v2996_v16, %s2721_s22 }
 0x9a5   :  { %895 = vrot.lane.b32.xlu0 %v3002_v31, %s2721_s22 }
 0x9a8   :  { %893 = vrot.lane.b32.xlu1 %v2998_v18, %s2721_s22 }
 0x9a9   :  { %1154 = vrot.lane.b32.xlu0 %v1096_v24, %s2714_s0 }
 0x9ac   :  { %897 = vrot.lane.b32.xlu1 %v3004_v33, %s2721_s22 }
 0x9ad   :  { %1158 = vrot.lane.b32.xlu0 %v1143_v43, %s2714_s0 }
 0x9b0   :  { %1156 = vrot.lane.b32.xlu1 %v1099_v30, %s2714_s0 }
 0x9b4   :  { %1160 = vrot.lane.b32.xlu1 %v1146_v45, %s2714_s0 }
 0xa05   :  { %v1299_v27 = vpop.xlane.xlu0 %1298 }
 0xa07   :  { %v1302_v38 = vpop.xlane.xlu1 %1301 }
 0xa08   :  { %2538 = vrcp.f32 %v1302_v38  ;;  %v2563_v38 = vld [vmem:[#allocation3 + $0x8] sm:$0xff] }
 0xa09   :  { %2540 = vrcp.f32 %v1299_v27 }
 0xa12   :  { %v2539_v16 = vpop.eup %2538 }
 0xa13   :  { %v2541_v39 = vpop.eup %2540  ;;  %v1314_v10 = vmul.f32 %v2539_v16, %v2533_v62 }
 0xa14   :  { %v1313_v18 = vmul.f32 %v2541_v39, %v2531_v60 }
 0xa16   :  { %v1317_v33 = vpack.c.bf16 %v1314_v10, %v1313_v18  ;;  %v2565_v10 = vld [vmem:[#allocation3 + $0x18] sm:$0xff] }
 0xa18   :  { %v1305_v31 = vpop.xlane.xlu0 %1304 }
 0xa19   :  { %2542 = vrcp.f32 %v1305_v31  ;;  %v2564_v31 = vld [vmem:[#allocation3 + $0x10] sm:$0xff] }
 0xa1c   :  { %v1308_v50 = vpop.xlane.xlu1 %1307  ;;  %v1320_v51 = vpop.permute.xlu0 %1319 }
 0xa1d   :  { %2544 = vrcp.f32 %v1308_v50  ;;  %2354 = vmatpush3.bf16.msra.mxu1 %v1320_v51  ;;  %v2442_v50 = vld [vmem:[#allocation9] ss:$8 sps:$4 sm:$0xff]   ;;  %v2444_v51 = vld [vmem:[#allocation9 + $0x4] ss:$8 sps:$4 sm:$0xff]  }
 0xa1e   :  { %2365 = vmatprep.subr.bf16.mxu1 %v2434_v34 }
 0xa20   :  { %v1367_v11 = vpop.permute.xlu1 %1366  ;;  %2356 = vmatmul.mubr.msk.bf16.vlgmr.msra.gmra.mrb[28].mxu1 %vm500_vm2, %v1317_v33  ;;  %v896_v12 = vpop.permute.xlu0 %895  ;;  %v2447_v33 = vld [vmem:[#allocation9 + $0x14] ss:$8 sps:$4 sm:$0xff]  }
 0xa21   :  { %906 = vst.msk [vmem:[#allocation2 + $0x10] sm:$0xff] %vm903_vm3, %v896_v12  ;;  %2360 = vmatpush3.bf16.msra.mxu0 %v1367_v11  ;;  %2366 = vmatpush3.bf16.msra.mxu1 %v2434_v34  ;;  %v2445_v11 = vld [vmem:[#allocation9 + $0x10] ss:$8 sps:$4 sm:$0xff]  }
 0xa22   :  { %2367 = vmatprep.subr.bf16.mxu1 %v2435_v35  ;;  %1741 = vmatprep.subr.bf16.mxu0 %v2444_v51 }
 0xa23   :  { %v2543_v15 = vpop.eup %2542 }
 0xa24   :  { %v892_v13 = vpop.permute.xlu1 %891  ;;  %v1155_v14 = vpop.permute.xlu0 %1154  ;;  %v1315_v19 = vmul.f32 %v2543_v15, %v2535_v6 }
 0xa25   :  { %904 = vst.msk [vmem:[#allocation2] sm:$0xff] %vm903_vm3, %v892_v13  ;;  %2368 = vmatpush3.bf16.msra.mxu1 %v2435_v35 }
 0xa26   :  { %1167 = vst.msk [vmem:[#allocation2] sm:$0xff] %vm1166_vm4, %v1155_v14  ;;  %2369 = vmatprep.subr.bf16.mxu1 %v2436_v36 }
 0xa27   :  { %v2545_v17 = vpop.eup %2544 }
 0xa28   :  { %v1316_v20 = vmul.f32 %v2545_v17, %v2537_v8  ;;  %v894_v21 = vpop.permute.xlu1 %893  ;;  %v1159_v22 = vpop.permute.xlu0 %1158  ;;  %v2562_v8 = vld [vmem:[#allocation3] sm:$0xff] }
 0xa29   :  { %905 = vst.msk [vmem:[#allocation2 + $0x8] sm:$0xff] %vm903_vm3, %v894_v21  ;;  %2370 = vmatpush3.bf16.msra.mxu1 %v2436_v36 }
 0xa2a   :  { %1169 = vst.msk [vmem:[#allocation2 + $0x10] sm:$0xff] %vm1166_vm4, %v1159_v22  ;;  %v1318_v24 = vpack.c.bf16 %v1316_v20, %v1315_v19  ;;  %2371 = vmatprep.subr.bf16.mxu1 %v2437_v37 }
 0xa2c   :  { %v898_v29 = vpop.permute.xlu1 %897  ;;  %2362 = vmatmul.mubr.msk.bf16.vlgmr.msra.gmra.mrb[40].mxu0 %vm500_vm2, %v1318_v24 }
 0xa2d   :  { %907 = vst.msk [vmem:[#allocation2 + $0x18] sm:$0xff] %vm903_vm3, %v898_v29  ;;  %1773 = vmatprep.mubr.bf16.mxu0 %v2717_v0  ;;  %2372 = vmatpush3.bf16.msra.mxu1 %v2437_v37  ;;  %v2450_v37 = vld [vmem:[#allocation9 + $0x24] ss:$8 sps:$4 sm:$0xff]  }
 0xa2e   :  { %2373 = vmatprep.subr.bf16.mxu1 %v2438_v41  ;;  %1742 = vmatpush1.bf16.msra.mxu0 %v2442_v50 }
 0xa2f   :  { %1743 = vmatprep.subr.bf16.mxu0 %v2447_v33  ;;  %v2133_v33 = vld [vmem:[%s3168_s10] ss:$0 sm:$0xff] }
 0xa30   :  { %v1157_v30 = vpop.permute.xlu1 %1156 }
 0xa31   :  { %1168 = vst.msk [vmem:[#allocation2 + $0x8] sm:$0xff] %vm1166_vm4, %v1157_v30  ;;  %2374 = vmatpush3.bf16.msra.mxu1 %v2438_v41  ;;  %v2448_v41 = vld [vmem:[#allocation9 + $0x20] ss:$8 sps:$4 sm:$0xff]  }
 0xa32   :  { %2375 = vmatprep.subr.bf16.mxu1 %v2439_v42  ;;  %1744 = vmatpush1.bf16.msra.mxu0 %v2445_v11 }
 0xa33   :  { %1745 = vmatprep.subr.bf16.mxu0 %v2450_v37 }
 0xa34   :  { %v1161_v32 = vpop.permute.xlu1 %1160 }
 0xa35   :  { %1170 = vst.msk [vmem:[#allocation2 + $0x18] sm:$0xff] %vm1166_vm4, %v1161_v32  ;;  %2376 = vmatpush3.bf16.msra.mxu1 %v2439_v42  ;;  %v2453_v42 = vld [vmem:[#allocation9 + $0x34] ss:$8 sps:$4 sm:$0xff]  }
 0xa36   :  { %2377 = vmatprep.subr.bf16.mxu1 %v2440_v46  ;;  %1746 = vmatpush1.bf16.msra.mxu0 %v2448_v41 }
 0xa37   :  { %1747 = vmatprep.subr.bf16.mxu0 %v2453_v42 }
 0xa39   :  { %2378 = vmatpush3.bf16.msra.mxu1 %v2440_v46  ;;  %v2459_v46 = vld [vmem:[#allocation9 + $0x54] ss:$8 sps:$4 sm:$0xff]  }
 0xa3a   :  { %2379 = vmatprep.subr.bf16.mxu1 %v2441_v23 }
 0xa3d   :  { %2380 = vmatpush3.bf16.msra.mxu1 %v2441_v23  ;;  %v2462_v23 = vld [vmem:[#allocation9 + $0x64] ss:$8 sps:$4 sm:$0xff]  }
 0xaf3   :  { %v1359_v43 = vpop.f32.mrb[28].mxu1 }
 0xaf4   :  { %1417 = vrot.lane.b32.xlu0 %v1359_v43, %s2720_s2  ;;  %v2357_v44 = vpop.f32.mrb[29].mxu1  ;;  %v2451_v43 = vld [vmem:[#allocation9 + $0x30] ss:$8 sps:$4 sm:$0xff]  }
 0xaf5   :  { %v1362_v45 = vpop.f32.mrb[30].mxu1  ;;  %1748 = vmatpush1.bf16.msra.mxu0 %v2451_v43  ;;  %v2456_v44 = vld [vmem:[#allocation9 + $0x44] ss:$8 sps:$4 sm:$0xff]  }
 0xaf6   :  { %1419 = vrot.lane.b32.xlu1 %v1362_v45, %s2720_s2  ;;  %v2358_v47 = vpop.f32.mrb[31].mxu1  ;;  %v2454_v45 = vld [vmem:[#allocation9 + $0x40] ss:$8 sps:$4 sm:$0xff]   ;;  %1749 = vmatprep.subr.bf16.mxu0 %v2456_v44 }
 0xaf7   :  { %v2457_v47 = vld [vmem:[#allocation9 + $0x50] ss:$8 sps:$4 sm:$0xff]  }
 0xaf9   :  { %1750 = vmatpush1.bf16.msra.mxu0 %v2454_v45 }
 0xafa   :  { %1751 = vmatprep.subr.bf16.mxu0 %v2459_v46 }
 0xafd   :  { %1752 = vmatpush1.bf16.msra.mxu0 %v2457_v47 }
 0xafe   :  { %1753 = vmatprep.subr.bf16.mxu0 %v2462_v23 }
 0xaff   :  { %v1406_v48 = vpop.f32.mrb[40].mxu0 }
 0xb00   :  { %1421 = vrot.lane.b32.xlu0 %v1406_v48, %s2720_s2  ;;  %v2363_v49 = vpop.f32.mrb[41].mxu0  ;;  %v2460_v48 = vld [vmem:[#allocation9 + $0x60] ss:$8 sps:$4 sm:$0xff]  }
 0xb01   :  { %v1409_v52 = vpop.f32.mrb[42].mxu0  ;;  %v2465_v49 = vld [vmem:[#allocation9 + $0x74] ss:$8 sps:$4 sm:$0xff]   ;;  %1754 = vmatpush1.bf16.msra.mxu0 %v2460_v48 }
 0xb02   :  { %1423 = vrot.lane.b32.xlu1 %v1409_v52, %s2720_s2  ;;  %v2364_v53 = vpop.f32.mrb[43].mxu0  ;;  %v2463_v52 = vld [vmem:[#allocation9 + $0x70] ss:$8 sps:$4 sm:$0xff]   ;;  %1755 = vmatprep.subr.bf16.mxu0 %v2465_v49 }
 0xb03   :  { %v2466_v53 = vld [vmem:[#allocation11 + $0x40] sm:$0xff]  }
 0xb04   :  { %2221 = vmatprep.subr.bf16.mxu1 %v2466_v53 }
 0xb05   :  { %1756 = vmatpush1.bf16.msra.mxu0 %v2463_v52 }
 0xb66   :  { %v1418_v54 = vpop.permute.xlu0 %1417 }
 0xb67   :  { %1430 = vst.msk [vmem:[#allocation2] sm:$0xff] %vm1429_vm5, %v1418_v54  ;;  %v2467_v54 = vld [vmem:[#allocation11] sm:$0xff]  }
 0xb68   :  { %v1420_v55 = vpop.permute.xlu1 %1419 }
 0xb69   :  { %1431 = vst.msk [vmem:[#allocation2 + $0x8] sm:$0xff] %vm1429_vm5, %v1420_v55  ;;  %v2468_v55 = vld [vmem:[#allocation11 + $0x48] sm:$0xff]  }
 0xb6e   :  { %v1434_v56 = vld [vmem:[#allocation2] sm:$0xff] }
 0xb70   :  { %v1435_v57 = vld [vmem:[#allocation2 + $0x8] sm:$0xff] }
 0xb71   :  { %v1438_v58 = vpack.c.bf16 %v1435_v57, %v1434_v56  ;;  %v2469_v56 = vld [vmem:[#allocation11 + $0x8] sm:$0xff]   ;;  %v2470_v57 = vld [vmem:[#allocation11 + $0x50] sm:$0xff]  }
 0xb72   :  { %v1422_v59 = vpop.permute.xlu0 %1421 }
 0xb73   :  { %1432 = vst.msk [vmem:[#allocation2 + $0x10] sm:$0xff] %vm1429_vm5, %v1422_v59  ;;  %2381 = vmatprep.mubr.bf16.mxu1 %v1438_v58  ;;  %v2471_v58 = vld [vmem:[#allocation11 + $0x10] sm:$0xff]   ;;  %v2472_v59 = vld [vmem:[#allocation11 + $0x58] sm:$0xff]  }
 0xb74   :  { %v1424_v60 = vpop.permute.xlu1 %1423 }
 0xb75   :  { %1433 = vst.msk [vmem:[#allocation2 + $0x18] sm:$0xff] %vm1429_vm5, %v1424_v60  ;;  %v2473_v60 = vld [vmem:[#allocation11 + $0x18] sm:$0xff]  }
 0xb7a   :  { %v1436_v61 = vld [vmem:[#allocation2 + $0x10] sm:$0xff] }
 0xb7c   :  { %v1437_v62 = vld [vmem:[#allocation2 + $0x18] sm:$0xff] }
 0xb7d   :  { %v1439_v63 = vpack.c.bf16 %v1437_v62, %v1436_v61  ;;  %v2474_v61 = vld [vmem:[#allocation11 + $0x60] sm:$0xff]  }
 0xb7e   :  { %v2475_v62 = vld [vmem:[#allocation11 + $0x20] sm:$0xff]  }
 0xb7f   :  { %2382 = vmatmul.mubr.bf16.vlgmr.msra.gmra.mrb[32].mxu1 %v1439_v63  ;;  %v2476_v63 = vld [vmem:[#allocation11 + $0x68] sm:$0xff]  }
 0xb80   :  { %2222 = vmatpush3.bf16.msra.mxu1 %v2467_v54 }
 0xb81   :  { %2223 = vmatprep.subr.bf16.mxu1 %v2468_v55 }
 0xb84   :  { %2224 = vmatpush3.bf16.msra.mxu1 %v2469_v56 }
 0xb85   :  { %2225 = vmatprep.subr.bf16.mxu1 %v2470_v57 }
 0xb88   :  { %2226 = vmatpush3.bf16.msra.mxu1 %v2471_v58 }
 0xb89   :  { %2227 = vmatprep.subr.bf16.mxu1 %v2472_v59 }
 0xb8c   :  { %2228 = vmatpush3.bf16.msra.mxu1 %v2473_v60 }
 0xb8d   :  { %2229 = vmatprep.subr.bf16.mxu1 %v2474_v61 }
 0xb90   :  { %2230 = vmatpush3.bf16.msra.mxu1 %v2475_v62 }
 0xb91   :  { %2231 = vmatprep.subr.bf16.mxu1 %v2476_v63 }
 0xc52   :  { %v2383_v2 = vpop.f32.mrb[32].mxu1 }
 0xc53   :  { %v1545_v40 = vpop.f32.mrb[33].mxu1  ;;  %v1554_v6 = vadd.f32 %v2383_v2, %v2123_v1 }
 0xc54   :  { %v1546_v3 = vadd.f32 %v2123_v1, %v1545_v40  ;;  %v2384_v4 = vpop.f32.mrb[34].mxu1 }
 0xc55   :  { %v1548_v5 = vpop.f32.mrb[35].mxu1  ;;  %v1557_v16 = vadd.f32 %v2384_v4, %v2123_v1  ;;  %v1562_v39 = vadd.f32 %v2564_v31, %v1554_v6  ;;  %v2132_v31 = vld [vmem:[%s3167_s9] ss:$0 sm:$0xff] }
 0xc56   :  { %v1549_v7 = vadd.f32 %v2123_v1, %v1548_v5  ;;  %v1560_v9 = vadd.f32 %v2562_v8, %v1546_v3 }
 0xc57   :  { %v1563_v18 = vadd.f32 %v2565_v10, %v1557_v16 }
 0xc58   :  { %1566 = vadd.xlane.f32.xlu0 %v1560_v9  ;;  %v1561_v27 = vadd.f32 %v2563_v38, %v1549_v7 }
 0xc5a   :  { %1568 = vadd.xlane.f32.xlu1 %v1561_v27 }
 0xc5c   :  { %1570 = vadd.xlane.f32.xlu0 %v1562_v39 }
 0xc60   :  { %1572 = vadd.xlane.f32.xlu0 %v1563_v18 }
 0xce5   :  { %v1567_v12 = vpop.xlane.xlu0 %1566 }
 0xce6   :  { %v1575_v13 = vmul.f32 0.0078125, %v1567_v12 }
 0xce7   :  { %v1569_v14 = vpop.xlane.xlu1 %1568 }
 0xce8   :  { %v3084_v15 = vsub.f32 %v1560_v9, %v1575_v13  ;;  %v1576_v17 = vmul.f32 0.0078125, %v1569_v14 }
 0xce9   :  { %v1571_v19 = vpop.xlane.xlu0 %1570 }
 0xcea   :  { %v3086_v20 = vsub.f32 %v1561_v27, %v1576_v17  ;;  %v1577_v21 = vmul.f32 0.0078125, %v1571_v19  ;;  %v1583_v22 = vmul.f32 %v3084_v15, %v3084_v15 }
 0xcec   :  { %v3090_v24 = vsub.f32 %v1562_v39, %v1577_v21  ;;  %1587 = vadd.xlane.f32.xlu0 %v1583_v22  ;;  %v1584_v29 = vmul.f32 %v3086_v20, %v3086_v20 }
 0xced   :  { %v1573_v30 = vpop.xlane.xlu0 %1572 }
 0xcee   :  { %v1578_v32 = vmul.f32 0.0078125, %v1573_v30  ;;  %1589 = vadd.xlane.f32.xlu1 %v1584_v29  ;;  %v1585_v34 = vmul.f32 %v3090_v24, %v3090_v24 }
 0xcf0   :  { %v3096_v35 = vsub.f32 %v1563_v18, %v1578_v32  ;;  %1591 = vadd.xlane.f32.xlu0 %v1585_v34  ;;  %v2478_v32 = vld [vmem:[#allocation11 + $0x70] sm:$0xff]  }
 0xcf1   :  { %v2479_v34 = vld [vmem:[#allocation11 + $0x30] sm:$0xff]  }
 0xcf2   :  { %v1586_v36 = vmul.f32 %v3096_v35, %v3096_v35 }
 0xcf4   :  { %1593 = vadd.xlane.f32.xlu1 %v1586_v36  ;;  %v2481_v36 = vld [vmem:[#allocation11 + $0x38] sm:$0xff]  }
 0xd79   :  { %v1588_v1 = vpop.xlane.xlu0 %1587 }
 0xd7a   :  { %v1595_v2 = vmul.f32 0.0078125, %v1588_v1 }
 0xd7b   :  { %v1590_v40 = vpop.xlane.xlu1 %1589 }
 0xd7c   :  { %v1599_v3 = vadd.f32 1e-05, %v1595_v2  ;;  %v1596_v4 = vmul.f32 0.0078125, %v1590_v40 }
 0xd7d   :  { %v1592_v5 = vpop.xlane.xlu0 %1591 }
 0xd7e   :  { %2546 = vrsqrt.f32 %v1599_v3  ;;  %v1600_v6 = vadd.f32 1e-05, %v1596_v4  ;;  %v1597_v7 = vmul.f32 0.0078125, %v1592_v5  ;;  %v2150_v5 = vld [vmem:[%s3166_s8] ss:$0 sm:$0xff] }
 0xd80   :  { %2548 = vrsqrt.f32 %v1600_v6  ;;  %v1601_v8 = vadd.f32 1e-05, %v1597_v7 }
 0xd81   :  { %v1594_v9 = vpop.xlane.xlu1 %1593 }
 0xd82   :  { %2550 = vrsqrt.f32 %v1601_v8  ;;  %v1598_v38 = vmul.f32 0.0078125, %v1594_v9 }
 0xd84   :  { %v1602_v27 = vadd.f32 1e-05, %v1598_v38 }
 0xd86   :  { %2552 = vrsqrt.f32 %v1602_v27 }
 0xd88   :  { %v2547_v16 = vpop.eup %2546 }
 0xd89   :  { %v1607_v39 = vmul.f32 %v2547_v16, %v3084_v15 }
 0xd8a   :  { %v2549_v10 = vpop.eup %2548 }
 0xd8b   :  { %v1608_v18 = vmul.f32 %v2549_v10, %v3086_v20  ;;  %v1617_v50 = vmul.f32 %v2132_v31, %v1607_v39 }
 0xd8c   :  { %v2551_v51 = vpop.eup %2550 }
 0xd8d   :  { %v1618_v11 = vmul.f32 %v2132_v31, %v1608_v18  ;;  %v3108_v12 = vadd.f32 %v2133_v33, %v1617_v50  ;;  %v1609_v14 = vmul.f32 %v2551_v51, %v3090_v24  ;;  %v2477_v24 = vld [vmem:[#allocation11 + $0x28] sm:$0xff]  }
 0xd8e   :  { %2232 = vmatpush3.bf16.msra.mxu1 %v2477_v24 }
 0xd8f   :  { %v3110_v13 = vadd.f32 %v2133_v33, %v1618_v11  ;;  %v1619_v20 = vmul.f32 %v2132_v31, %v1609_v14  ;;  %2233 = vmatprep.subr.bf16.mxu1 %v2478_v32 }
 0xd90   :  { %v2553_v17 = vpop.eup %2552 }
 0xd91   :  { %v1631_v15 = vpack.c.bf16 %v3110_v13, %v3108_v12  ;;  %v1610_v19 = vmul.f32 %v2553_v17, %v3096_v35  ;;  %v3119_v29 = vadd.f32 %v2133_v33, %v1619_v20  ;;  %v2480_v35 = vld [vmem:[#allocation11 + $0x78] sm:$0xff]  }
 0xd92   :  { %2234 = vmatpush3.bf16.msra.mxu1 %v2479_v34 }
 0xd93   :  { %1774 = vmatmul.mubr.bf16.vlgmr.msra.gmra.mrb[44].mxu0 %v1631_v15  ;;  %v1620_v21 = vmul.f32 %v2132_v31, %v1610_v19  ;;  %2235 = vmatprep.subr.bf16.mxu1 %v2480_v35 }
 0xd94   :  { %1783 = vmatprep.mubr.bf16.mxu0 %v2717_v0  ;;  %v1649_v0 = vld [vmem:[%s3164_s6] sm:$0x3] }
 0xd95   :  { %v3117_v22 = vadd.f32 %v2133_v33, %v1620_v21  ;;  %v1654_v37 = vrot.slane %v1649_v0, %v156_v26  ;;  %v1658_v41 = vrot.slane %v1649_v0, %v160_v28 }
 0xd96   :  { %2236 = vmatpush3.bf16.msra.mxu1 %v2481_v36 }
 0xd97   :  { %v1632_v30 = vpack.c.bf16 %v3117_v22, %v3119_v29 }
 0xd9b   :  { %1784 = vmatmul.mubr.bf16.gmra.mrb[48].mxu0 %v1632_v30 }
 0xe66   :  { %v1775_v42 = vpop.f32.mrb[44].mxu0 }
 0xe67   :  { %v1776_v43 = vadd.f32 %v1775_v42, %v1654_v37  ;;  %v1777_v44 = vpop.f32.mrb[45].mxu0 }
 0xe68   :  { %v1778_v45 = vadd.f32 %v1777_v44, %v1658_v41  ;;  %v1779_v46 = vpop.f32.mrb[46].mxu0 }
 0xe69   :  { %v1780_v47 = vadd.f32 %v1779_v46, %v1654_v37  ;;  %v1781_v23 = vpop.f32.mrb[47].mxu0  ;;  %v1794_v49 = vmax.f32 %v1776_v43, 0.0 }
 0xe6a   :  { %v1782_v48 = vadd.f32 %v1781_v23, %v1658_v41  ;;  %v1795_v53 = vmax.f32 %v1778_v45, 0.0 }
 0xe6b   :  { %v1796_v52 = vmax.f32 %v1780_v47, 0.0 }
 0xe6c   :  { %v1797_v54 = vmax.f32 %v1782_v48, 0.0 }
 0xe6d   :  { %v1802_v55 = vpack.c.bf16 %v1796_v52, %v1794_v49 }
 0xe6e   :  { %v1803_v56 = vpack.c.bf16 %v1797_v54, %v1795_v53  ;;  %v1785_v57 = vpop.f32.mrb[48].mxu0 }
 0xe6f   :  { %v1786_v58 = vadd.f32 %v1785_v57, %v1654_v37  ;;  %v1787_v26 = vpop.f32.mrb[49].mxu0  ;;  %v2167_v57 = vld [vmem:[%s3169_s11] ss:$0 sm:$0xff]  ;;  %s2069_s11 = sshll.u32 %s2722_s14, 4  ;;  %s2070_s11 = int_to_ptr.vmem [resolvable:$true] %s2069_s11 }
 0xe70   :  { %v1788_v59 = vadd.f32 %v1787_v26, %v1658_v41  ;;  %v1789_v25 = vpop.f32.mrb[50].mxu0  ;;  %1973 = vmatprep.mubr.bf16.mxu1 %v1803_v56  ;;  %p2681_p13 = scmp.lt.s32.totalorder %s2070_s11, %s2070_s11 }
 0xe71   :  { %v1790_v28 = vadd.f32 %v1789_v25, %v1654_v37  ;;  %v1791_v60 = vpop.f32.mrb[51].mxu0  ;;  %1974 = vmatmul.mubr.bf16.vlgmr.msra.gmra.mrb[36].mxu1 %v1802_v55  ;;  %v1798_v62 = vmax.f32 %v1786_v58, 0.0 }
 0xe72   :  { %v1792_v61 = vadd.f32 %v1791_v60, %v1658_v41  ;;  %v1799_v1 = vmax.f32 %v1788_v59, 0.0  ;;  %v2168_v59 = vld [vmem:[%s3170_s12] ss:$0 sm:$0xff]  ;;  %s2676_s12 = scalar_lea.vmem %s2070_s11, 512 }
 0xe73   :  { %v1800_v63 = vmax.f32 %v1790_v28, 0.0  ;;  %p2677_p12 = scmp.ne.s32.totalorder %s2070_s11, %s2676_s12  ;;  %p2682_p0 = scmp.lt.s32.totalorder %s2676_s12, %s2676_s12 }
 0xe74   :  { %v1801_v2 = vmax.f32 %v1792_v61, 0.0 }
 0xe75   :  { %v1804_v40 = vpack.c.bf16 %v1800_v63, %v1798_v62  ;;  %p2683_p1 = por %p2682_p0, %p2681_p13 }
 0xe76   :  { %v1805_v3 = vpack.c.bf16 %v1801_v2, %v1799_v1 }
 0xe77   :  { %p2684_p2 = pnand %p2683_p1, %p2677_p12 }
 0xe78   :  { %1981 = vmatprep.mubr.bf16.mxu1 %v1805_v3 }
 0xe79   :  { %1982 = vmatmul.mubr.bf16.gmra.mrb[40].mxu1 %v1804_v40 }
 0xf44   :  { %v2237_v4 = vpop.f32.mrb[36].mxu1 }
 0xf45   :  { %v2238_v6 = vpop.f32.mrb[37].mxu1 }
 0xf46   :  { %v2239_v7 = vadd.f32 %v2238_v6, %v2237_v4  ;;  %v2240_v8 = vpop.f32.mrb[38].mxu1 }
 0xf47   :  { %v2241_v9 = vpop.f32.mrb[39].mxu1 }
 0xf48   :  { %v1976_v38 = vadd.f32 %v2239_v7, %v2150_v5  ;;  %v2242_v27 = vadd.f32 %v2241_v9, %v2240_v8 }
 0xf4a   :  { %v1979_v16 = vadd.f32 %v2242_v27, %v2150_v5  ;;  %v1990_v31 = vadd.f32 %v1976_v38, %v3108_v12 }
 0xf4c   :  { %v2243_v39 = vpop.f32.mrb[40].mxu1  ;;  %1996 = vadd.xlane.f32.xlu0 %v1990_v31  ;;  %v1991_v10 = vadd.f32 %v1979_v16, %v3110_v13 }
 0xf4d   :  { %v2244_v18 = vpop.f32.mrb[41].mxu1 }
 0xf4e   :  { %v2245_v50 = vadd.f32 %v2244_v18, %v2243_v39  ;;  %v2246_v51 = vpop.f32.mrb[42].mxu1  ;;  %1998 = vadd.xlane.f32.xlu1 %v1991_v10 }
 0xf4f   :  { %v2247_v33 = vpop.f32.mrb[43].mxu1 }
 0xf50   :  { %v1984_v11 = vadd.f32 %v2245_v50, %v2150_v5  ;;  %v2248_v14 = vadd.f32 %v2247_v33, %v2246_v51 }
 0xf52   :  { %v1987_v17 = vadd.f32 %v2248_v14, %v2150_v5  ;;  %v1992_v15 = vadd.f32 %v1984_v11, %v3119_v29 }
 0xf54   :  { %2000 = vadd.xlane.f32.xlu0 %v1992_v15  ;;  %v1993_v19 = vadd.f32 %v1987_v17, %v3117_v22 }
 0xf56   :  { %2002 = vadd.xlane.f32.xlu1 %v1993_v19 }
 0xfd9   :  { %v1997_v20 = vpop.xlane.xlu0 %1996 }
 0xfda   :  { %v2004_v12 = vmul.f32 0.0078125, %v1997_v20 }
 0xfdb   :  { %v1999_v21 = vpop.xlane.xlu1 %1998 }
 0xfdc   :  { %v2008_v30 = vsub.f32 %v1990_v31, %v2004_v12  ;;  %v2005_v24 = vmul.f32 0.0078125, %v1999_v21 }
 0xfde   :  { %v2009_v13 = vsub.f32 %v1991_v10, %v2005_v24  ;;  %v2012_v32 = vmul.f32 %v2008_v30, %v2008_v30 }
 0xfe0   :  { %2016 = vadd.xlane.f32.xlu0 %v2012_v32  ;;  %v2013_v34 = vmul.f32 %v2009_v13, %v2009_v13 }
 0xfe1   :  { %v2001_v35 = vpop.xlane.xlu0 %2000 }
 0xfe2   :  { %v2006_v36 = vmul.f32 0.0078125, %v2001_v35  ;;  %2018 = vadd.xlane.f32.xlu1 %v2013_v34 }
 0xfe3   :  { %v2003_v0 = vpop.xlane.xlu1 %2002 }
 0xfe4   :  { %v2010_v37 = vsub.f32 %v1992_v15, %v2006_v36  ;;  %v2007_v41 = vmul.f32 0.0078125, %v2003_v0 }
 0xfe6   :  { %v2011_v29 = vsub.f32 %v1993_v19, %v2007_v41  ;;  %v2014_v42 = vmul.f32 %v2010_v37, %v2010_v37 }
 0xfe8   :  { %2020 = vadd.xlane.f32.xlu0 %v2014_v42  ;;  %v2015_v22 = vmul.f32 %v2011_v29, %v2011_v29 }
 0xfea   :  { %2022 = vadd.xlane.f32.xlu1 %v2015_v22 }
0x106d   :  { %v2017_v43 = vpop.xlane.xlu0 %2016 }
0x106e   :  { %v2024_v44 = vmul.f32 0.0078125, %v2017_v43 }
0x106f   :  { %v2019_v45 = vpop.xlane.xlu1 %2018 }
0x1070   :  { %v2028_v46 = vadd.f32 1e-05, %v2024_v44  ;;  %v2025_v47 = vmul.f32 0.0078125, %v2019_v45 }
0x1072   :  { %2554 = vrsqrt.f32 %v2028_v46  ;;  %v2029_v23 = vadd.f32 1e-05, %v2025_v47 }
0x1074   :  { %2556 = vrsqrt.f32 %v2029_v23 }
0x1075   :  { %v2021_v48 = vpop.xlane.xlu0 %2020 }
0x1076   :  { %v2026_v49 = vmul.f32 0.0078125, %v2021_v48 }
0x1077   :  { %v2023_v52 = vpop.xlane.xlu1 %2022 }
0x1078   :  { %v2030_v53 = vadd.f32 1e-05, %v2026_v49  ;;  %v2027_v54 = vmul.f32 0.0078125, %v2023_v52 }
0x107a   :  { %2558 = vrsqrt.f32 %v2030_v53  ;;  %v2031_v55 = vadd.f32 1e-05, %v2027_v54 }
0x107c   :  { %v2555_v56 = vpop.eup %2554  ;;  %2560 = vrsqrt.f32 %v2031_v55 }
0x107d   :  { %v2036_v58 = vmul.f32 %v2555_v56, %v2008_v30 }
0x107e   :  { %v2557_v26 = vpop.eup %2556 }
0x107f   :  { %v2037_v25 = vmul.f32 %v2557_v26, %v2009_v13  ;;  %v2046_v28 = vmul.f32 %v2167_v57, %v2036_v58 }
0x1081   :  { %v2047_v60 = vmul.f32 %v2167_v57, %v2037_v25  ;;  %v2056_v61 = vadd.f32 %v2168_v59, %v2046_v28 }
0x1083   :  { %v2057_v62 = vadd.f32 %v2168_v59, %v2047_v60  ;;  %2060 = vst [vmem:[#allocation12] sm:$0xff] %v2056_v61 }
0x1084   :  { %v2559_v63 = vpop.eup %2558 }
0x1085   :  { %v2038_v1 = vmul.f32 %v2559_v63, %v2010_v37  ;;  %2061 = vst [vmem:[#allocation12 + $0x8] sm:$0xff] %v2057_v62 }
0x1086   :  { %v2561_v2 = vpop.eup %2560 }
0x1087   :  { %v2039_v40 = vmul.f32 %v2561_v2, %v2011_v29  ;;  %v2048_v3 = vmul.f32 %v2167_v57, %v2038_v1 }
0x1089   :  { %v2049_v4 = vmul.f32 %v2167_v57, %v2039_v40  ;;  %v2058_v5 = vadd.f32 %v2168_v59, %v2048_v3 }
0x108b   :  { %v2059_v6 = vadd.f32 %v2168_v59, %v2049_v4  ;;  %2062 = vst [vmem:[#allocation12 + $0x10] sm:$0xff] %v2058_v5 }
0x108d   :  { %2063 = vst [vmem:[#allocation12 + $0x18] sm:$0xff] %v2059_v6 }
0x108e   :  { %2687 = shalt.err (!%p2684_p2)
}
0x108f   :  { %s2688_s18 = scalar_lea.hbm %s3171_s13, 512 }
0x1090   :  { %p2689_p3 = scmp.ne.s32.totalorder %s3171_s13, %s2688_s18  ;;  %p2692_p4 = scmp.lt.u32.totalorder %s2688_s18, %s3171_s13 }
0x1092   :  { %p2694_p5 = pnand %p2692_p4, %p2689_p3 }
0x1094   :  { %2697 = shalt.err (!%p2694_p5)
}
0x1095   :  { %2075 = dma.vmem_to_hbm [thread:$0]  %s2070_s11, 512, %s3171_s13, [#allocation5], %s2711_s26, %s2711_s26, %s2712_s17  }
0x1096   :  { %2704 = dma.done.wait [#allocation5], 512  }
0x1097   :  { %2705 = vsyncadd [#allocation5], 4294966784 }
0x1098   :  { %2079 = vsyncpa [#allocation4], 1 }
0x1099   :  { %2080 = vsyncpa [#allocation7], 1 }
0x109a   :  { %2081 = vsyncpa [#allocation10], 1 }
0x109b   :  { %2082 = vsyncpa [#allocation5], 1 }

</bundles_post_ra>
